<compile_context>
chip_gen: v7x
topology: tpu7x:2x2x1
jax: 0.10.0
libtpu: 0.0.40
codegen_flags: <defaults>
</compile_context>

<pallas_src>
import functools

import jax
import jax.numpy as jnp
from jax.experimental import pallas as pl
from jax.experimental.pallas import tpu as pltpu

LAYERS = [2, 50, 50, 50, 50, 4]


def _pinn_kernel(x_ref,
                 w0_ref, b0_ref,
                 w1_ref, b1_ref,
                 w2_ref, b2_ref,
                 w3_ref, b3_ref,
                 w4_ref, b4_ref,
                 o_ref):
    # Feature-major: h is (features, tile_n); batch on the lane axis.
    h = x_ref[...]                                                # (2, TILE_N)

    # Hidden layers: Linear + Tanh (matmul on MXU, tanh on EUP).
    h = jnp.tanh(jnp.dot(w0_ref[...], h, preferred_element_type=jnp.float32)
                 + b0_ref[...])
    h = jnp.tanh(jnp.dot(w1_ref[...], h, preferred_element_type=jnp.float32)
                 + b1_ref[...])
    h = jnp.tanh(jnp.dot(w2_ref[...], h, preferred_element_type=jnp.float32)
                 + b2_ref[...])
    h = jnp.tanh(jnp.dot(w3_ref[...], h, preferred_element_type=jnp.float32)
                 + b3_ref[...])

    # Output layer: Linear only (no activation). Lane-dense (4, TILE_N) store.
    o_ref[...] = (jnp.dot(w4_ref[...], h, preferred_element_type=jnp.float32)
                  + b4_ref[...]).astype(o_ref.dtype)


def _round_up(v, m):
    return (v + m - 1) // m * m


@functools.partial(jax.jit, static_argnames=("tile_n",))
def pinn_forward(x, params, tile_n=1024):
    """x: (N, 2) float32; params: list of (W, b) with W (out, in), b (out, 1).

    Matches PyTorch nn.Linear semantics: y = x @ W.T + b.
    """
    n, d_in = x.shape
    assert d_in == LAYERS[0]
    assert tile_n % 128 == 0
    d_out = LAYERS[-1]

    # Clamp the tile for tiny batches; pad the batch to a tile multiple.
    tile = min(tile_n, _round_up(n, 128))
    n_pad = _round_up(n, tile)

    # Feature-major: (N, 2) -> (2, N_pad). Batch rides the lane axis.
    xt = jnp.pad(x, ((0, n_pad - n), (0, 0))).T

    # Flatten params into a single argument list: w0, b0, w1, b1, ...
    flat_params = []
    for w, b in params:
        flat_params.extend([w, b])

    # Input/output tiled along the (lane-axis) batch dim; weights/biases are
    # tiny (<= 50x50) and fully resident (block_shape == full array shape,
    # constant index_map).
    x_spec = pl.BlockSpec((d_in, tile), lambda i: (0, i))
    o_spec = pl.BlockSpec((d_out, tile), lambda i: (0, i))
    param_specs = []
    for w, b in params:
        param_specs.append(pl.BlockSpec(w.shape, lambda i: (0, 0)))
        param_specs.append(pl.BlockSpec(b.shape, lambda i: (0, 0)))

    out_t = pl.pallas_call(
        _pinn_kernel,
        out_shape=jax.ShapeDtypeStruct((d_out, n_pad), x.dtype),
        grid_spec=pltpu.PrefetchScalarGridSpec(
            num_scalar_prefetch=0,
            grid=(n_pad // tile,),
            in_specs=[x_spec] + param_specs,
            out_specs=o_spec,
        ),
        compiler_params=pltpu.CompilerParams(
            dimension_semantics=("parallel",)),
    )(xt, *flat_params)

    # Back to PyTorch's (N, out) layout, drop the padding rows.
    return out_t.T[:n]


def init_params(key):
    """Deterministic init matching nn.Linear's default (uniform(+-1/sqrt(fan_in)))."""
    params = []
    for i in range(len(LAYERS) - 1):
        fan_in, fan_out = LAYERS[i], LAYERS[i + 1]
        key, kw, kb = jax.random.split(key, 3)
        bound = 1.0 / jnp.sqrt(jnp.float32(fan_in))
        # Native PyTorch layout: W (out, in); bias stored as (out, 1) column.
        w = jax.random.uniform(kw, (fan_out, fan_in), jnp.float32,
                               minval=-bound, maxval=bound)
        b = jax.random.uniform(kb, (fan_out, 1), jnp.float32,
                               minval=-bound, maxval=bound)
        params.append((w, b))
    return params


def pinn_forward_ref(x, params):
    """Pure-JAX reference of the PyTorch forward pass."""
    h = x
    for i, (w, b) in enumerate(params):
        h = h @ w.T + b[:, 0]
        if i < len(params) - 1:
            h = jnp.tanh(h)
    return h


if __name__ == "__main__":
    key = jax.random.PRNGKey(0)
    key, kx = jax.random.split(key)

    # Deterministic collocation points in the PINN domain [0,10] x [0,5].
    # Not tile-aligned on purpose, to exercise the padding path; big enough
    # that the grid has >= 2 steps (both TCs busy on v7x).
    n_points = 2500
    lb = jnp.array([0.0, 0.0], jnp.float32)
    ub = jnp.array([10.0, 5.0], jnp.float32)
    x = lb + (ub - lb) * jax.random.uniform(kx, (n_points, 2), jnp.float32)

    params = init_params(key)

    out = pinn_forward(x, params, tile_n=1024)
    out = jax.block_until_ready(out)

    ref = pinn_forward_ref(x, params)
    assert out.shape == (n_points, 4)
    assert jnp.allclose(out, ref, atol=1e-5, rtol=1e-5), "mismatch vs reference"

    print("KERNEL_OK")
</pallas_src>

<mosaic_0001>
module attributes {stable_mosaic.version = 11 : i64} {
  func.func @_pinn_kernel(%arg0: i32, %arg1: memref<2x1024xf32, #tpu.memory_space<vmem>>, %arg2: memref<50x2xf32, #tpu.memory_space<vmem>>, %arg3: memref<50x1xf32, #tpu.memory_space<vmem>>, %arg4: memref<50x50xf32, #tpu.memory_space<vmem>>, %arg5: memref<50x1xf32, #tpu.memory_space<vmem>>, %arg6: memref<50x50xf32, #tpu.memory_space<vmem>>, %arg7: memref<50x1xf32, #tpu.memory_space<vmem>>, %arg8: memref<50x50xf32, #tpu.memory_space<vmem>>, %arg9: memref<50x1xf32, #tpu.memory_space<vmem>>, %arg10: memref<4x50xf32, #tpu.memory_space<vmem>>, %arg11: memref<4x1xf32, #tpu.memory_space<vmem>>, %arg12: memref<4x1024xf32, #tpu.memory_space<vmem>>) attributes {dimension_semantics = [#tpu.dimension_semantics<parallel>], iteration_bounds = array<i64: 3>, scalar_prefetch = 0 : i64, scratch_operands = 0 : i64, tpu.core_type = #tpu.core_type<tc>, window_params = [{transform_indices = @transform_0, window_bounds = array<i64: 2, 1024>}, {pipeline_mode = #tpu.pipeline_mode<synchronous>, transform_indices = @transform_1, window_bounds = array<i64: 50, 2>}, {pipeline_mode = #tpu.pipeline_mode<synchronous>, transform_indices = @transform_2, window_bounds = array<i64: 50, 1>}, {pipeline_mode = #tpu.pipeline_mode<synchronous>, transform_indices = @transform_3, window_bounds = array<i64: 50, 50>}, {pipeline_mode = #tpu.pipeline_mode<synchronous>, transform_indices = @transform_4, window_bounds = array<i64: 50, 1>}, {pipeline_mode = #tpu.pipeline_mode<synchronous>, transform_indices = @transform_5, window_bounds = array<i64: 50, 50>}, {pipeline_mode = #tpu.pipeline_mode<synchronous>, transform_indices = @transform_6, window_bounds = array<i64: 50, 1>}, {pipeline_mode = #tpu.pipeline_mode<synchronous>, transform_indices = @transform_7, window_bounds = array<i64: 50, 50>}, {pipeline_mode = #tpu.pipeline_mode<synchronous>, transform_indices = @transform_8, window_bounds = array<i64: 50, 1>}, {pipeline_mode = #tpu.pipeline_mode<synchronous>, transform_indices = @transform_9, window_bounds = array<i64: 4, 50>}, {pipeline_mode = #tpu.pipeline_mode<synchronous>, transform_indices = @transform_10, window_bounds = array<i64: 4, 1>}, {transform_indices = @transform_11, window_bounds = array<i64: 4, 1024>}]} {
    %c0 = arith.constant 0 : index
    %c0_0 = arith.constant 0 : index
    %0 = vector.load %arg1[%c0, %c0_0] : memref<2x1024xf32, #tpu.memory_space<vmem>>, vector<2x1024xf32>
    %c0_1 = arith.constant 0 : index
    %c0_2 = arith.constant 0 : index
    %1 = vector.load %arg2[%c0_1, %c0_2] : memref<50x2xf32, #tpu.memory_space<vmem>>, vector<50x2xf32>
    %cst = arith.constant dense<0.000000e+00> : vector<50x1024xf32>
    %2 = tpu.matmul %1, %0, %cst {dimension_numbers = #tpu.dot_dimension_numbers<[1], [0], [0], [1], [0, 0, 1, 1], [], []>} : vector<50x2xf32>, vector<2x1024xf32>, vector<50x1024xf32> -> vector<50x1024xf32>
    %c0_3 = arith.constant 0 : index
    %c0_4 = arith.constant 0 : index
    %3 = vector.load %arg3[%c0_3, %c0_4] : memref<50x1xf32, #tpu.memory_space<vmem>>, vector<50x1xf32>
    %4 = vector.broadcast %3 : vector<50x1xf32> to vector<50x1024xf32>
    %5 = arith.addf %2, %4 : vector<50x1024xf32>
    %6 = math.tanh %5 : vector<50x1024xf32>
    %c0_5 = arith.constant 0 : index
    %c0_6 = arith.constant 0 : index
    %7 = vector.load %arg4[%c0_5, %c0_6] : memref<50x50xf32, #tpu.memory_space<vmem>>, vector<50x50xf32>
    %cst_7 = arith.constant dense<0.000000e+00> : vector<50x1024xf32>
    %8 = tpu.matmul %7, %6, %cst_7 {dimension_numbers = #tpu.dot_dimension_numbers<[1], [0], [0], [1], [0, 0, 1, 1], [], []>} : vector<50x50xf32>, vector<50x1024xf32>, vector<50x1024xf32> -> vector<50x1024xf32>
    %c0_8 = arith.constant 0 : index
    %c0_9 = arith.constant 0 : index
    %9 = vector.load %arg5[%c0_8, %c0_9] : memref<50x1xf32, #tpu.memory_space<vmem>>, vector<50x1xf32>
    %10 = vector.broadcast %9 : vector<50x1xf32> to vector<50x1024xf32>
    %11 = arith.addf %8, %10 : vector<50x1024xf32>
    %12 = math.tanh %11 : vector<50x1024xf32>
    %c0_10 = arith.constant 0 : index
    %c0_11 = arith.constant 0 : index
    %13 = vector.load %arg6[%c0_10, %c0_11] : memref<50x50xf32, #tpu.memory_space<vmem>>, vector<50x50xf32>
    %cst_12 = arith.constant dense<0.000000e+00> : vector<50x1024xf32>
    %14 = tpu.matmul %13, %12, %cst_12 {dimension_numbers = #tpu.dot_dimension_numbers<[1], [0], [0], [1], [0, 0, 1, 1], [], []>} : vector<50x50xf32>, vector<50x1024xf32>, vector<50x1024xf32> -> vector<50x1024xf32>
    %c0_13 = arith.constant 0 : index
    %c0_14 = arith.constant 0 : index
    %15 = vector.load %arg7[%c0_13, %c0_14] : memref<50x1xf32, #tpu.memory_space<vmem>>, vector<50x1xf32>
    %16 = vector.broadcast %15 : vector<50x1xf32> to vector<50x1024xf32>
    %17 = arith.addf %14, %16 : vector<50x1024xf32>
    %18 = math.tanh %17 : vector<50x1024xf32>
    %c0_15 = arith.constant 0 : index
    %c0_16 = arith.constant 0 : index
    %19 = vector.load %arg8[%c0_15, %c0_16] : memref<50x50xf32, #tpu.memory_space<vmem>>, vector<50x50xf32>
    %cst_17 = arith.constant dense<0.000000e+00> : vector<50x1024xf32>
    %20 = tpu.matmul %19, %18, %cst_17 {dimension_numbers = #tpu.dot_dimension_numbers<[1], [0], [0], [1], [0, 0, 1, 1], [], []>} : vector<50x50xf32>, vector<50x1024xf32>, vector<50x1024xf32> -> vector<50x1024xf32>
    %c0_18 = arith.constant 0 : index
    %c0_19 = arith.constant 0 : index
    %21 = vector.load %arg9[%c0_18, %c0_19] : memref<50x1xf32, #tpu.memory_space<vmem>>, vector<50x1xf32>
    %22 = vector.broadcast %21 : vector<50x1xf32> to vector<50x1024xf32>
    %23 = arith.addf %20, %22 : vector<50x1024xf32>
    %24 = math.tanh %23 : vector<50x1024xf32>
    %c0_20 = arith.constant 0 : index
    %c0_21 = arith.constant 0 : index
    %25 = vector.load %arg10[%c0_20, %c0_21] : memref<4x50xf32, #tpu.memory_space<vmem>>, vector<4x50xf32>
    %cst_22 = arith.constant dense<0.000000e+00> : vector<4x1024xf32>
    %26 = tpu.matmul %25, %24, %cst_22 {dimension_numbers = #tpu.dot_dimension_numbers<[1], [0], [0], [1], [0, 0, 1, 1], [], []>} : vector<4x50xf32>, vector<50x1024xf32>, vector<4x1024xf32> -> vector<4x1024xf32>
    %c0_23 = arith.constant 0 : index
    %c0_24 = arith.constant 0 : index
    %27 = vector.load %arg11[%c0_23, %c0_24] : memref<4x1xf32, #tpu.memory_space<vmem>>, vector<4x1xf32>
    %28 = vector.broadcast %27 : vector<4x1xf32> to vector<4x1024xf32>
    %29 = arith.addf %26, %28 : vector<4x1024xf32>
    %c0_25 = arith.constant 0 : index
    %c0_26 = arith.constant 0 : index
    %30 = vector.load %arg12[%c0_25, %c0_26] : memref<4x1024xf32, #tpu.memory_space<vmem>>, vector<4x1024xf32>
    tpu.vector_store %arg12[%c0_25, %c0_26], %29 {strides = array<i32>} : memref<4x1024xf32, #tpu.memory_space<vmem>>, vector<4x1024xf32>,
    return
  }
  func.func @transform_0(%arg0: i32) -> (i32, i32) {
    %c0_i32 = arith.constant 0 : i32
    %c0_i32_0 = arith.constant 0 : i32
    return %c0_i32, %arg0 : i32, i32
  }
  func.func @transform_1(%arg0: i32) -> (i32, i32) {
    %c0_i32 = arith.constant 0 : i32
    %c0_i32_0 = arith.constant 0 : i32
    %c0_i32_1 = arith.constant 0 : i32
    return %c0_i32, %c0_i32_0 : i32, i32
  }
  func.func @transform_2(%arg0: i32) -> (i32, i32) {
    %c0_i32 = arith.constant 0 : i32
    %c0_i32_0 = arith.constant 0 : i32
    %c0_i32_1 = arith.constant 0 : i32
    return %c0_i32, %c0_i32_0 : i32, i32
  }
  func.func @transform_3(%arg0: i32) -> (i32, i32) {
    %c0_i32 = arith.constant 0 : i32
    %c0_i32_0 = arith.constant 0 : i32
    %c0_i32_1 = arith.constant 0 : i32
    return %c0_i32, %c0_i32_0 : i32, i32
  }
  func.func @transform_4(%arg0: i32) -> (i32, i32) {
    %c0_i32 = arith.constant 0 : i32
    %c0_i32_0 = arith.constant 0 : i32
    %c0_i32_1 = arith.constant 0 : i32
    return %c0_i32, %c0_i32_0 : i32, i32
  }
  func.func @transform_5(%arg0: i32) -> (i32, i32) {
    %c0_i32 = arith.constant 0 : i32
    %c0_i32_0 = arith.constant 0 : i32
    %c0_i32_1 = arith.constant 0 : i32
    return %c0_i32, %c0_i32_0 : i32, i32
  }
  func.func @transform_6(%arg0: i32) -> (i32, i32) {
    %c0_i32 = arith.constant 0 : i32
    %c0_i32_0 = arith.constant 0 : i32
    %c0_i32_1 = arith.constant 0 : i32
    return %c0_i32, %c0_i32_0 : i32, i32
  }
  func.func @transform_7(%arg0: i32) -> (i32, i32) {
    %c0_i32 = arith.constant 0 : i32
    %c0_i32_0 = arith.constant 0 : i32
    %c0_i32_1 = arith.constant 0 : i32
    return %c0_i32, %c0_i32_0 : i32, i32
  }
  func.func @transform_8(%arg0: i32) -> (i32, i32) {
    %c0_i32 = arith.constant 0 : i32
    %c0_i32_0 = arith.constant 0 : i32
    %c0_i32_1 = arith.constant 0 : i32
    return %c0_i32, %c0_i32_0 : i32, i32
  }
  func.func @transform_9(%arg0: i32) -> (i32, i32) {
    %c0_i32 = arith.constant 0 : i32
    %c0_i32_0 = arith.constant 0 : i32
    %c0_i32_1 = arith.constant 0 : i32
    return %c0_i32, %c0_i32_0 : i32, i32
  }
  func.func @transform_10(%arg0: i32) -> (i32, i32) {
    %c0_i32 = arith.constant 0 : i32
    %c0_i32_0 = arith.constant 0 : i32
    %c0_i32_1 = arith.constant 0 : i32
    return %c0_i32, %c0_i32_0 : i32, i32
  }
  func.func @transform_11(%arg0: i32) -> (i32, i32) {
    %c0_i32 = arith.constant 0 : i32
    %c0_i32_0 = arith.constant 0 : i32
    return %c0_i32, %arg0 : i32, i32
  }
}

</mosaic_0001>

<bundles_post_ra>
// kernel: pinn_forward.1
= control target key start
LH: loop header
LB: loop body
LE: loop exit
PB: predicated region body
PF: predicated region fallthrough
CT: control target
= control target key end

     0   :  { %s4022_s17 = smov 0   ;;  %s4901_s0 = inlined_call_operand.vmem [shape: f32[2,3072], index: 0, kind: input, shape index: {}]   ;;  %s4902_s1 = inlined_call_operand.vmem [shape: f32[50,2], index: 1, kind: input, shape index: {}]   ;;  %s4903_s2 = inlined_call_operand.vmem [shape: f32[50,1], index: 2, kind: input, shape index: {}]   ;;  %s4904_s3 = inlined_call_operand.vmem [shape: f32[50,50], index: 3, kind: input, shape index: {}]   ;;  %s4905_s4 = inlined_call_operand.vmem [shape: f32[50,1], index: 4, kind: input, shape index: {}]   ;;  %s4906_s5 = inlined_call_operand.vmem [shape: f32[50,50], index: 5, kind: input, shape index: {}]   ;;  %s4907_s6 = inlined_call_operand.vmem [shape: f32[50,1], index: 6, kind: input, shape index: {}]   ;;  %s4908_s7 = inlined_call_operand.vmem [shape: f32[50,50], index: 7, kind: input, shape index: {}]   ;;  %s4909_s8 = inlined_call_operand.vmem [shape: f32[50,1], index: 8, kind: input, shape index: {}]   ;;  %s4910_s9 = inlined_call_operand.vmem [shape: f32[4,50], index: 9, kind: input, shape index: {}]   ;;  %s4911_s10 = inlined_call_operand.vmem [shape: f32[4,1], index: 10, kind: input, shape index: {}]   ;;  %s4912_s11 = inlined_call_operand.vmem [shape: f32[4,3072], index: 11, kind: output, shape index: {}]  }
   0x1 LB: > { %s3129_s18 = sadd.s32 4294967295, %s3957_s17   ;;  %p3133_p0 = scmp.ge.s32.totalorder %s3957_s17, 1  ;;  %s3957_s17 = sphi %s4022_s17, %s21_s17  }
   0x2   : > { %p338_p1 = scmp.lt.s32.totalorder %s3957_s17, 4 }
   0x4   : > { %p339_p2 = pnand %p3133_p0, %p338_p1 }
   0x5   : > { %s3134_s19 = sshll.u32 (!%p339_p2), %s3129_s18, 3  ;;  %v447_v0 = vlaneseq (!%p339_p2)  ;;  %v3959_v1 = vmov (!%p339_p2), 1983009808   ;;  %v3960_v3 = vmov (!%p339_p2), 0.0   ;;  %v3961_v5 = vmov (!%p339_p2), 0   ;;  %v399_v7 = vld [vmem:[%s4903_s2] sm:$0xff] (!%p339_p2) }
   0x6   : > { %342 = sbr.rel (%p339_p2) target bundleno = 1290 (0x50a), region = 64  ;;  %p379_p3 = scmp.lt.s32.totalorder (!%p339_p2), %s3134_s19, 23  ;;  %v445_v2 = vunpack.c.l.s4 (!%p339_p2), %v3959_v1  ;;  %580 = vmatprep.mubr.f32.mxu0 (!%p339_p2), %v3960_v3  ;;  %687 = vmatprep.mubr.f32.mxu1 (!%p339_p2), %v3960_v3  ;;  %v401_v8 = vld [vmem:[%s4903_s2 + $0x10] sm:$0xff] (!%p339_p2)  ;;  %v400_v10 = vld [vmem:[%s4903_s2 + $0x8] sm:$0xff] (!%p339_p2)  ;;  %v402_v11 = vld [vmem:[%s4903_s2 + $0x18] sm:$0xff] (!%p339_p2)  ;;  %vm499_vm0 = vcmask (!%p339_p2), 1041408  }
   0x7   : > { %v448_v4 = vshrl.u32 (!%p339_p2), %v447_v0, 7  ;;  %3499 = vset.pattern.permute.xlu0 (!%p339_p2), %v3961_v5  ;;  %3500 = vset.pattern.permute.xlu1 (!%p339_p2), %v3961_v5  ;;  %v403_v18 = vld [vmem:[%s4903_s2 + $0x20] sm:$0xff] (!%p339_p2)  ;;  %v404_v22 = vld [vmem:[%s4903_s2 + $0x28] sm:$0xff] (!%p339_p2)  ;;  %vm477_vm1 = vcmask (!%p339_p2), 15360   ;;  %v405_v28 = vld [vmem:[%s4903_s2 + $0x30] sm:$0x3] (!%p339_p2) }
   0x8   : > { %v446_v6 = vunpack.c.0.s8 (!%p339_p2), %v445_v2  ;;  %408 = vperm.xlu0 (!%p339_p2), %3499, %v399_v7   ;;  %418 = vperm.xlu1 (!%p339_p2), %3500, %v401_v8   ;;  %v4059_v23 = vld [vmem:[%s4902_s1] sm:$0xff] (!%p339_p2)  ;;  %v4071_v27 = vld [vmem:[%s4902_s1 + $0x8] sm:$0xff] (!%p339_p2)  ;;  %v4091_v30 = vld [vmem:[%s4902_s1 + $0x10] sm:$0xff] (!%p339_p2)  ;;  %vm1049_vm2 = vcmask (!%p339_p2), 408576  }
   0x9   : > { %v1007_v29 = vld [vmem:[%s4905_s4] sm:$0xff] (!%p339_p2)  ;;  %v1008_v31 = vld [vmem:[%s4905_s4 + $0x8] sm:$0xff] (!%p339_p2)  ;;  %v1009_v32 = vld [vmem:[%s4905_s4 + $0x10] sm:$0xff] (!%p339_p2) }
   0xa   : > { %v449_v9 = vsub.s32 (!%p339_p2), %v446_v6, %v448_v4  ;;  %v4109_v33 = vld [vmem:[%s4902_s1 + $0x18] sm:$0xff] (!%p339_p2)  ;;  %v1011_v35 = vld [vmem:[%s4905_s4 + $0x20] sm:$0xff] (!%p339_p2)  ;;  %v1012_v37 = vld [vmem:[%s4905_s4 + $0x28] sm:$0xff] (!%p339_p2) }
   0xb   : > { %v1010_v34 = vld [vmem:[%s4905_s4 + $0x18] sm:$0xff] (!%p339_p2)  ;;  %v4126_v36 = vld [vmem:[%s4902_s1 + $0x20] sm:$0xff] (!%p339_p2)  ;;  %v1013_v38 = vld [vmem:[%s4905_s4 + $0x30] sm:$0x3] (!%p339_p2) }
   0xc   : > { %413 = vperm.xlu0 (!%p339_p2), %3499, %v400_v10   ;;  %423 = vperm.xlu1 (!%p339_p2), %3500, %v402_v11   ;;  %v4143_v39 = vld [vmem:[%s4902_s1 + $0x28] sm:$0xff] (!%p339_p2)  ;;  %v1586_v40 = vld [vmem:[%s4907_s6] sm:$0xff] (!%p339_p2)  ;;  %v398_v42 = vld [vmem:[%s4902_s1 + $0x30] sm:$0x3] (!%p339_p2) }
   0xd   : > { %s4914_s19 = smov (!%p379_p3, %s3134_s19), 23  ;;  %v1587_v41 = vld [vmem:[%s4907_s6 + $0x8] sm:$0xff]  ;;  %v1588_v43 = vld [vmem:[%s4907_s6 + $0x10] sm:$0xff]  ;;  %v1589_v44 = vld [vmem:[%s4907_s6 + $0x18] sm:$0xff] }
   0xe   : > { %s3135_s24 = sshll.u32 %s4914_s19, 1  ;;  %v1590_v45 = vld [vmem:[%s4907_s6 + $0x20] sm:$0xff]  ;;  %v1591_v46 = vld [vmem:[%s4907_s6 + $0x28] sm:$0xff]  ;;  %v1592_v47 = vld [vmem:[%s4907_s6 + $0x30] sm:$0x3]  ;;  %s3137_s21 = sshll.u32 %s4914_s19, 2 }
   0xf   : > { %s382_s29 = scalar_lea.vmem %s4901_s0, %s3135_s24  ;;  %v2164_v48 = vld [vmem:[%s4909_s8] sm:$0xff]  ;;  %v2165_v49 = vld [vmem:[%s4909_s8 + $0x8] sm:$0xff]  ;;  %v2166_v50 = vld [vmem:[%s4909_s8 + $0x10] sm:$0xff]  ;;  %s388_s24 = scalar_lea.vmem %s4912_s11, %s3137_s21 }
  0x10   : > { %v390_v12 = vld [vmem:[%s382_s29] sm:$0xff]  ;;  %v391_v13 = vld [vmem:[%s382_s29 + $0x8] sm:$0xff]  ;;  %428 = vperm.xlu0 %3499, %v403_v18   ;;  %433 = vperm.xlu1 %3500, %v404_v22   ;;  %v2167_v51 = vld [vmem:[%s4909_s8 + $0x18] sm:$0xff] }
  0x11   : > { %v450_v14 = vrot.slane %v390_v12, %v449_v9  ;;  %v460_v15 = vcombine.high %v391_v13, %v391_v13  ;;  %v467_v16 = vrot.slane %v391_v13, %v449_v9  ;;  %v443_v17 = vcombine.high %v390_v12, %v390_v12  ;;  %v2168_v52 = vld [vmem:[%s4909_s8 + $0x20] sm:$0xff]  ;;  %v2169_v53 = vld [vmem:[%s4909_s8 + $0x28] sm:$0xff]  ;;  %v2170_v54 = vld [vmem:[%s4909_s8 + $0x30] sm:$0x3] }
  0x12   : > { %v2736_v55 = vld [vmem:[%s4911_s10] sm:$0xf] }
  0x13   : > { %v458_v19 = vcombine.high %v450_v14, %v450_v14  ;;  %v457_v20 = vrot.slane %v443_v17, %v449_v9  ;;  %v474_v21 = vrot.slane %v460_v15, %v449_v9  ;;  %v475_v25 = vcombine.high %v467_v16, %v467_v16 }
  0x14   : > { %438 = vperm.xlu0 %3499, %v405_v28   ;;  %1016 = vperm.xlu1 %3500, %v1007_v29  }
  0x15   : > { %3138 = vmatprep.subr.msk.mxu0 %vm499_vm0, %v458_v19  ;;  %v459_v24 = vcombine.high %v457_v20, %v457_v20  ;;  %v476_v26 = vcombine.high %v474_v21, %v474_v21 }
  0x16   : > { %3139 = vmatpush1.msk.msra.mxu0 %vm499_vm0, %v450_v14 }
  0x17   : > { %3140 = vmatmul.mubr.msk.f32.vlgmr.msra.gmra.mrb[0].mxu0 %vm477_vm1, %v4059_v23  ;;  %3147 = vmatprep.subr.msk.mxu1 %vm499_vm0, %v459_v24 }
  0x18   : > { %3148 = vmatpush1.msk.msra.mxu1 %vm499_vm0, %v457_v20  ;;  %586 = vmatprep.mubr.f32.mxu0 %v3960_v3 }
  0x19   : > { %3149 = vmatmul.mubr.msk.f32.vlgmr.msra.gmra.mrb[0].mxu1 %vm477_vm1, %v4059_v23  ;;  %3156 = vmatprep.subr.msk.mxu0 %vm499_vm0, %v475_v25 }
  0x1a   : > { %693 = vmatprep.mubr.f32.mxu1 %v3960_v3  ;;  %3165 = vmatprep.subr.msk.mxu1 %vm499_vm0, %v476_v26 }
  0x1b   : > { %3141 = vmatmul.mubr.msk.f32.gmra.mrb[2].mxu0 %vm477_vm1, %v4071_v27  ;;  %3166 = vmatpush1.msk.msra.mxu1 %vm499_vm0, %v474_v21 }
  0x1c   : > { %592 = vmatprep.mubr.f32.mxu0 %v3960_v3  ;;  %3157 = vmatpush1.msk.msra.mxu0 %vm499_vm0, %v467_v16 }
  0x1d   : > { %3150 = vmatmul.mubr.msk.f32.gmra.mrb[2].mxu1 %vm477_vm1, %v4071_v27  ;;  %1021 = vperm.xlu0 %3499, %v1008_v31  }
  0x1e   : > { %699 = vmatprep.mubr.f32.mxu1 %v3960_v3  ;;  %1026 = vperm.xlu1 %3500, %v1009_v32  }
  0x1f   : > { %3142 = vmatmul.mubr.msk.f32.gmra.mrb[4].mxu0 %vm477_vm1, %v4091_v30 }
  0x20   : > { %598 = vmatprep.mubr.f32.mxu0 %v3960_v3 }
  0x21   : > { %3151 = vmatmul.mubr.msk.f32.gmra.mrb[4].mxu1 %vm477_vm1, %v4091_v30  ;;  %1031 = vperm.xlu0 %3499, %v1010_v34  }
  0x22   : > { %705 = vmatprep.mubr.f32.mxu1 %v3960_v3  ;;  %1036 = vperm.xlu1 %3500, %v1011_v35  }
  0x23   : > { %3143 = vmatmul.mubr.msk.f32.gmra.mrb[6].mxu0 %vm477_vm1, %v4109_v33 }
  0x24   : > { %604 = vmatprep.mubr.f32.mxu0 %v3960_v3 }
  0x25   : > { %3152 = vmatmul.mubr.msk.f32.gmra.mrb[6].mxu1 %vm477_vm1, %v4109_v33  ;;  %1041 = vperm.xlu0 %3499, %v1012_v37  }
  0x26   : > { %711 = vmatprep.mubr.f32.mxu1 %v3960_v3  ;;  %1046 = vperm.xlu1 %3500, %v1013_v38  }
  0x27   : > { %3144 = vmatmul.mubr.msk.f32.gmra.mrb[8].mxu0 %vm477_vm1, %v4126_v36 }
  0x28   : > { %610 = vmatprep.mubr.f32.mxu0 %v3960_v3 }
  0x29   : > { %3153 = vmatmul.mubr.msk.f32.gmra.mrb[8].mxu1 %vm477_vm1, %v4126_v36  ;;  %1595 = vperm.xlu0 %3499, %v1586_v40  }
  0x2a   : > { %717 = vmatprep.mubr.f32.mxu1 %v3960_v3  ;;  %1600 = vperm.xlu1 %3500, %v1587_v41  }
  0x2b   : > { %3145 = vmatmul.mubr.msk.f32.gmra.mrb[10].mxu0 %vm477_vm1, %v4143_v39 }
  0x2c   : > { %616 = vmatprep.mubr.f32.mxu0 %v3960_v3 }
  0x2d   : > { %3154 = vmatmul.mubr.msk.f32.gmra.mrb[10].mxu1 %vm477_vm1, %v4143_v39  ;;  %1605 = vperm.xlu0 %3499, %v1588_v43  }
  0x2e   : > { %723 = vmatprep.mubr.f32.mxu1 %v3960_v3  ;;  %1610 = vperm.xlu1 %3500, %v1589_v44  }
  0x2f   : > { %3146 = vmatmul.mubr.msk.f32.gmra.mrb[12].mxu0 %vm477_vm1, %v398_v42 }
  0x30   : > { %794 = vmatprep.mubr.f32.mxu0 %v3960_v3 }
  0x31   : > { %3155 = vmatmul.mubr.msk.f32.gmra.mrb[12].mxu1 %vm477_vm1, %v398_v42  ;;  %1615 = vperm.xlu0 %3499, %v1590_v45  }
  0x32   : > { %901 = vmatprep.mubr.f32.mxu1 %v3960_v3  ;;  %1620 = vperm.xlu1 %3500, %v1591_v46  }
  0x33   : > { %3158 = vmatmul.mubr.msk.f32.vlgmr.msra.gmra.mrb[14].mxu0 %vm477_vm1, %v4059_v23 }
  0x34   : > { %800 = vmatprep.mubr.f32.mxu0 %v3960_v3 }
  0x35   : > { %3167 = vmatmul.mubr.msk.f32.vlgmr.msra.gmra.mrb[14].mxu1 %vm477_vm1, %v4059_v23  ;;  %1625 = vperm.xlu0 %3499, %v1592_v47  }
  0x36   : > { %907 = vmatprep.mubr.f32.mxu1 %v3960_v3  ;;  %2173 = vperm.xlu1 %3500, %v2164_v48  }
  0x37   : > { %3159 = vmatmul.mubr.msk.f32.gmra.mrb[16].mxu0 %vm477_vm1, %v4071_v27 }
  0x38   : > { %806 = vmatprep.mubr.f32.mxu0 %v3960_v3 }
  0x39   : > { %3168 = vmatmul.mubr.msk.f32.gmra.mrb[16].mxu1 %vm477_vm1, %v4071_v27  ;;  %2178 = vperm.xlu0 %3499, %v2165_v49  }
  0x3a   : > { %913 = vmatprep.mubr.f32.mxu1 %v3960_v3  ;;  %2183 = vperm.xlu1 %3500, %v2166_v50  }
  0x3b   : > { %3160 = vmatmul.mubr.msk.f32.gmra.mrb[18].mxu0 %vm477_vm1, %v4091_v30 }
  0x3c   : > { %812 = vmatprep.mubr.f32.mxu0 %v3960_v3 }
  0x3d   : > { %3169 = vmatmul.mubr.msk.f32.gmra.mrb[18].mxu1 %vm477_vm1, %v4091_v30  ;;  %2188 = vperm.xlu0 %3499, %v2167_v51  }
  0x3e   : > { %919 = vmatprep.mubr.f32.mxu1 %v3960_v3  ;;  %2193 = vperm.xlu1 %3500, %v2168_v52  }
  0x3f   : > { %3161 = vmatmul.mubr.msk.f32.gmra.mrb[20].mxu0 %vm477_vm1, %v4109_v33 }
  0x40   : > { %818 = vmatprep.mubr.f32.mxu0 %v3960_v3 }
  0x41   : > { %3170 = vmatmul.mubr.msk.f32.gmra.mrb[20].mxu1 %vm477_vm1, %v4109_v33  ;;  %2198 = vperm.xlu0 %3499, %v2169_v53  }
  0x42   : > { %925 = vmatprep.mubr.f32.mxu1 %v3960_v3  ;;  %2203 = vperm.xlu1 %3500, %v2170_v54  }
  0x43   : > { %3162 = vmatmul.mubr.msk.f32.gmra.mrb[22].mxu0 %vm477_vm1, %v4126_v36 }
  0x44   : > { %824 = vmatprep.mubr.f32.mxu0 %v3960_v3 }
  0x45   : > { %3171 = vmatmul.mubr.msk.f32.gmra.mrb[22].mxu1 %vm477_vm1, %v4126_v36  ;;  %2739 = vperm.xlu0 %3499, %v2736_v55  }
  0x46   : > { %931 = vmatprep.mubr.f32.mxu1 %v3960_v3 }
  0x47   : > { %3163 = vmatmul.mubr.msk.f32.gmra.mrb[24].mxu0 %vm477_vm1, %v4143_v39 }
  0x48   : > { %830 = vmatprep.mubr.f32.mxu0 %v3960_v3 }
  0x49   : > { %3172 = vmatmul.mubr.msk.f32.gmra.mrb[24].mxu1 %vm477_vm1, %v4143_v39 }
  0x4a   : > { %937 = vmatprep.mubr.f32.mxu1 %v3960_v3 }
  0x4b   : > { %3164 = vmatmul.mubr.msk.f32.gmra.mrb[26].mxu0 %vm477_vm1, %v398_v42 }
  0x4c   : > { %1159 = vmatprep.mubr.f32.mxu0 %v3960_v3 }
  0x4d   : > { %3173 = vmatmul.mubr.msk.f32.gmra.mrb[26].mxu1 %vm477_vm1, %v398_v42 }
  0x4e   : > { %1266 = vmatprep.mubr.f32.mxu1 %v3960_v3 }
  0x87   : > { %v4246_v56 = vpop.permute.xlu0 %408  ;;  %v4255_v6 = vpop.permute.xlu1 %418 }
  0x8b   : > { %v4251_v0 = vpop.permute.xlu0 %413  ;;  %v4263_v19 = vpop.permute.xlu1 %423 }
  0x8f   : > { %v4269_v32 = vpop.permute.xlu0 %428  ;;  %v4275_v47 = vpop.permute.xlu1 %433 }
  0xea   : > { %v582_v57 = vpop.f32.mrb[0].mxu0 }
  0xeb   : > { %v583_v58 = vadd.f32 %v582_v57, %v4246_v56  ;;  %v584_v59 = vpop.f32.mrb[1].mxu0 }
  0xec   : > { %v585_v60 = vadd.f32 %v584_v59, %v4246_v56  ;;  %v689_v61 = vpop.f32.mrb[0].mxu1 }
  0xed   : > { %3503 = vtanh.f32 %v583_v58  ;;  %v690_v62 = vadd.f32 %v689_v61, %v4246_v56  ;;  %v691_v63 = vpop.f32.mrb[1].mxu1 }
  0xee   : > { %3505 = vtanh.f32 %v585_v60  ;;  %v692_v1 = vadd.f32 %v691_v63, %v4246_v56  ;;  %v588_v2 = vpop.f32.mrb[2].mxu0  ;;  %v4281_v63 = vpop.permute.xlu0 %438 }
  0xef   : > { %3507 = vtanh.f32 %v690_v62  ;;  %v589_v4 = vadd.f32 %v588_v2, %v4251_v0  ;;  %v590_v5 = vpop.f32.mrb[3].mxu0 }
  0xf0   : > { %3509 = vtanh.f32 %v692_v1  ;;  %v591_v7 = vadd.f32 %v590_v5, %v4251_v0  ;;  %v695_v8 = vpop.f32.mrb[2].mxu1 }
  0xf1   : > { %3511 = vtanh.f32 %v589_v4  ;;  %v696_v9 = vadd.f32 %v695_v8, %v4251_v0  ;;  %v697_v10 = vpop.f32.mrb[3].mxu1 }
  0xf2   : > { %3513 = vtanh.f32 %v591_v7  ;;  %v698_v11 = vadd.f32 %v697_v10, %v4251_v0  ;;  %v594_v12 = vpop.f32.mrb[4].mxu0 }
  0xf3   : > { %3515 = vtanh.f32 %v696_v9  ;;  %v595_v13 = vadd.f32 %v594_v12, %v4255_v6  ;;  %v596_v14 = vpop.f32.mrb[5].mxu0 }
  0xf4   : > { %3517 = vtanh.f32 %v698_v11  ;;  %v597_v15 = vadd.f32 %v596_v14, %v4255_v6  ;;  %v701_v16 = vpop.f32.mrb[4].mxu1 }
  0xf5   : > { %3519 = vtanh.f32 %v595_v13  ;;  %v702_v17 = vadd.f32 %v701_v16, %v4255_v6  ;;  %v703_v18 = vpop.f32.mrb[5].mxu1 }
  0xf6   : > { %3521 = vtanh.f32 %v597_v15  ;;  %v704_v20 = vadd.f32 %v703_v18, %v4255_v6  ;;  %v600_v21 = vpop.f32.mrb[6].mxu0 }
  0xf7   : > { %v3504_v22 = vpop.eup %3503  ;;  %3523 = vtanh.f32 %v702_v17  ;;  %v601_v23 = vadd.f32 %v600_v21, %v4263_v19  ;;  %v602_v24 = vpop.f32.mrb[7].mxu0 }
  0xf8   : > { %v3506_v25 = vpop.eup %3505  ;;  %3525 = vtanh.f32 %v704_v20  ;;  %v603_v26 = vadd.f32 %v602_v24, %v4263_v19  ;;  %v707_v27 = vpop.f32.mrb[6].mxu1 }
  0xf9   : > { %v3508_v28 = vpop.eup %3507  ;;  %3527 = vtanh.f32 %v601_v23  ;;  %v708_v29 = vadd.f32 %v707_v27, %v4263_v19  ;;  %v709_v30 = vpop.f32.mrb[7].mxu1 }
  0xfa   : > { %v3510_v31 = vpop.eup %3509  ;;  %3529 = vtanh.f32 %v603_v26  ;;  %v710_v33 = vadd.f32 %v709_v30, %v4263_v19  ;;  %v606_v34 = vpop.f32.mrb[8].mxu0 }
  0xfb   : > { %v3512_v35 = vpop.eup %3511  ;;  %3531 = vtanh.f32 %v708_v29  ;;  %v607_v36 = vadd.f32 %v606_v34, %v4269_v32  ;;  %v608_v37 = vpop.f32.mrb[9].mxu0 }
  0xfc   : > { %v3514_v38 = vpop.eup %3513  ;;  %3533 = vtanh.f32 %v710_v33  ;;  %v609_v39 = vadd.f32 %v608_v37, %v4269_v32  ;;  %v713_v40 = vpop.f32.mrb[8].mxu1  ;;  %v3298_v41 = vpack.c.bf16 %v3512_v35, %v3504_v22 }
  0xfd   : > { %v3516_v42 = vpop.eup %3515  ;;  %3535 = vtanh.f32 %v607_v36  ;;  %v714_v43 = vadd.f32 %v713_v40, %v4269_v32  ;;  %v715_v44 = vpop.f32.mrb[9].mxu1  ;;  %v3296_v45 = vpack.c.bf16 %v3514_v38, %v3506_v25 }
  0xfe   : > { %v3518_v46 = vpop.eup %3517  ;;  %3537 = vtanh.f32 %v609_v39  ;;  %v716_v48 = vadd.f32 %v715_v44, %v4269_v32  ;;  %v612_v49 = vpop.f32.mrb[10].mxu0  ;;  %v3310_v50 = vpack.c.bf16 %v3516_v42, %v3508_v28 }
  0xff   : > { %v3520_v51 = vpop.eup %3519  ;;  %3539 = vtanh.f32 %v714_v43  ;;  %v613_v52 = vadd.f32 %v612_v49, %v4275_v47  ;;  %v614_v53 = vpop.f32.mrb[11].mxu0  ;;  %3297 = vmatprep.subr.bf16.mxu0 %v3296_v45  ;;  %v3308_v54 = vpack.c.bf16 %v3518_v46, %v3510_v31 }
 0x100   : > { %v3522_v55 = vpop.eup %3521  ;;  %3541 = vtanh.f32 %v716_v48  ;;  %v615_v57 = vadd.f32 %v614_v53, %v4275_v47  ;;  %v719_v58 = vpop.f32.mrb[10].mxu1  ;;  %3299 = vmatpush1.bf16.msra.mxu0 %v3298_v41 }
 0x101   : > { %v3524_v59 = vpop.eup %3523  ;;  %3543 = vtanh.f32 %v613_v52  ;;  %v720_v60 = vadd.f32 %v719_v58, %v4275_v47  ;;  %v721_v61 = vpop.f32.mrb[11].mxu1  ;;  %3309 = vmatprep.subr.bf16.mxu1 %v3308_v54 }
 0x102   : > { %v3526_v62 = vpop.eup %3525  ;;  %3545 = vtanh.f32 %v615_v57  ;;  %v722_v1 = vadd.f32 %v721_v61, %v4275_v47  ;;  %v618_v2 = vpop.f32.mrb[12].mxu0  ;;  %3311 = vmatpush1.bf16.msra.mxu1 %v3310_v50 }
 0x103   : > { %v3528_v4 = vpop.eup %3527  ;;  %3547 = vtanh.f32 %v720_v60  ;;  %v619_v5 = vadd.f32 %v618_v2, %v4281_v63  ;;  %v620_v7 = vpop.f32.mrb[13].mxu0 }
 0x104   : > { %v3530_v8 = vpop.eup %3529  ;;  %3549 = vtanh.f32 %v722_v1  ;;  %v621_v9 = vadd.f32 %v620_v7, %v4281_v63  ;;  %v725_v10 = vpop.f32.mrb[12].mxu1  ;;  %v3302_v11 = vpack.c.bf16 %v3528_v4, %v3520_v51  ;;  %v4304_v1 = vld [vmem:[%s4904_s3] sm:$0xff] }
 0x105   : > { %v3532_v12 = vpop.eup %3531  ;;  %3551 = vtanh.f32 %v619_v5  ;;  %v726_v13 = vadd.f32 %v725_v10, %v4281_v63  ;;  %v727_v14 = vpop.f32.mrb[13].mxu1  ;;  %v3300_v15 = vpack.c.bf16 %v3530_v8, %v3522_v55 }
 0x106   : > { %v3534_v16 = vpop.eup %3533  ;;  %3553 = vtanh.f32 %v621_v9  ;;  %v728_v17 = vadd.f32 %v727_v14, %v4281_v63  ;;  %v796_v18 = vpop.f32.mrb[14].mxu0  ;;  %v3314_v20 = vpack.c.bf16 %v3532_v12, %v3524_v59 }
 0x107   : > { %v3536_v21 = vpop.eup %3535  ;;  %3555 = vtanh.f32 %v726_v13  ;;  %v797_v22 = vadd.f32 %v796_v18, %v4246_v56  ;;  %v798_v23 = vpop.f32.mrb[15].mxu0  ;;  %3301 = vmatprep.subr.bf16.mxu0 %v3300_v15  ;;  %v3312_v24 = vpack.c.bf16 %v3534_v16, %v3526_v62  ;;  %v4319_v15 = vld [vmem:[%s4904_s3 + $0x8] sm:$0xff] }
 0x108   : > { %v3538_v25 = vpop.eup %3537  ;;  %3557 = vtanh.f32 %v728_v17  ;;  %v799_v26 = vadd.f32 %v798_v23, %v4246_v56  ;;  %v903_v27 = vpop.f32.mrb[14].mxu1  ;;  %3303 = vmatpush1.bf16.msra.mxu0 %v3302_v11 }
 0x109   : > { %v3540_v28 = vpop.eup %3539  ;;  %3559 = vtanh.f32 %v797_v22  ;;  %v904_v29 = vadd.f32 %v903_v27, %v4246_v56  ;;  %v905_v30 = vpop.f32.mrb[15].mxu1  ;;  %3313 = vmatprep.subr.bf16.mxu1 %v3312_v24 }
 0x10a   : > { %v3542_v31 = vpop.eup %3541  ;;  %3561 = vtanh.f32 %v799_v26  ;;  %v906_v33 = vadd.f32 %v905_v30, %v4246_v56  ;;  %v802_v34 = vpop.f32.mrb[16].mxu0  ;;  %3315 = vmatpush1.bf16.msra.mxu1 %v3314_v20  ;;  %v4334_v30 = vld [vmem:[%s4904_s3 + $0x10] sm:$0xff] }
 0x10b   : > { %v3544_v35 = vpop.eup %3543  ;;  %3563 = vtanh.f32 %v904_v29  ;;  %v803_v36 = vadd.f32 %v802_v34, %v4251_v0  ;;  %v804_v37 = vpop.f32.mrb[17].mxu0 }
 0x10c   : > { %v3546_v38 = vpop.eup %3545  ;;  %3565 = vtanh.f32 %v906_v33  ;;  %v805_v39 = vadd.f32 %v804_v37, %v4251_v0  ;;  %v909_v40 = vpop.f32.mrb[16].mxu1  ;;  %v3306_v41 = vpack.c.bf16 %v3544_v35, %v3536_v21 }
 0x10d   : > { %v3548_v42 = vpop.eup %3547  ;;  %3567 = vtanh.f32 %v803_v36  ;;  %v910_v43 = vadd.f32 %v909_v40, %v4251_v0  ;;  %v911_v44 = vpop.f32.mrb[17].mxu1  ;;  %v3304_v45 = vpack.c.bf16 %v3546_v38, %v3538_v25 }
 0x10e   : > { %v3550_v56 = vpop.eup %3549  ;;  %3569 = vtanh.f32 %v805_v39  ;;  %v912_v46 = vadd.f32 %v911_v44, %v4251_v0  ;;  %v808_v48 = vpop.f32.mrb[18].mxu0  ;;  %v3318_v49 = vpack.c.bf16 %v3548_v42, %v3540_v28 }
 0x10f   : > { %v3552_v50 = vpop.eup %3551  ;;  %3571 = vtanh.f32 %v910_v43  ;;  %v809_v51 = vadd.f32 %v808_v48, %v4255_v6  ;;  %v810_v52 = vpop.f32.mrb[19].mxu0  ;;  %3305 = vmatprep.subr.bf16.mxu0 %v3304_v45  ;;  %v3316_v53 = vpack.c.bf16 %v3550_v56, %v3542_v31  ;;  %v4349_v45 = vld [vmem:[%s4904_s3 + $0x18] sm:$0xff] }
 0x110   : > { %v3554_v54 = vpop.eup %3553  ;;  %3573 = vtanh.f32 %v912_v46  ;;  %v811_v55 = vadd.f32 %v810_v52, %v4255_v6  ;;  %v915_v57 = vpop.f32.mrb[18].mxu1  ;;  %3307 = vmatpush1.bf16.msra.mxu0 %v3306_v41 }
 0x111   : > { %v3556_v58 = vpop.eup %3555  ;;  %3575 = vtanh.f32 %v809_v51  ;;  %v916_v59 = vadd.f32 %v915_v57, %v4255_v6  ;;  %v917_v0 = vpop.f32.mrb[19].mxu1  ;;  %3174 = vmatprep.subr.msk.mxu0 %vm499_vm0, %v3554_v54  ;;  %3317 = vmatprep.subr.bf16.mxu1 %v3316_v53 }
 0x112   : > { %v3558_v60 = vpop.eup %3557  ;;  %3577 = vtanh.f32 %v811_v55  ;;  %v918_v61 = vadd.f32 %v917_v0, %v4255_v6  ;;  %v814_v62 = vpop.f32.mrb[20].mxu0  ;;  %3319 = vmatpush1.bf16.msra.mxu1 %v3318_v49 }
 0x113   : > { %v3560_v2 = vpop.eup %3559  ;;  %3579 = vtanh.f32 %v916_v59  ;;  %v815_v4 = vadd.f32 %v814_v62, %v4263_v19  ;;  %v816_v5 = vpop.f32.mrb[21].mxu0  ;;  %3183 = vmatprep.subr.msk.mxu1 %vm499_vm0, %v3558_v60 }
 0x114   : > { %v3562_v7 = vpop.eup %3561  ;;  %3581 = vtanh.f32 %v918_v61  ;;  %v817_v8 = vadd.f32 %v816_v5, %v4263_v19  ;;  %v921_v6 = vpop.f32.mrb[20].mxu1  ;;  %3175 = vmatpush1.msk.msra.mxu0 %vm499_vm0, %v3552_v50  ;;  %v1005_v5 = vld [vmem:[%s4904_s3 + $0x28] sm:$0xff] }
 0x115   : > { %v3564_v9 = vpop.eup %3563  ;;  %3583 = vtanh.f32 %v815_v4  ;;  %v922_v10 = vadd.f32 %v921_v6, %v4263_v19  ;;  %v923_v11 = vpop.f32.mrb[21].mxu1  ;;  %3176 = vmatmul.mubr.msk.f32.vlgmr.msra.gmra.mrb[28].mxu0 %vm1049_vm2, %v4304_v1 }
 0x116   : > { %v3566_v12 = vpop.eup %3565  ;;  %3585 = vtanh.f32 %v817_v8  ;;  %v924_v13 = vadd.f32 %v923_v11, %v4263_v19  ;;  %v820_v14 = vpop.f32.mrb[22].mxu0  ;;  %3184 = vmatpush1.msk.msra.mxu1 %vm499_vm0, %v3556_v58  ;;  %1165 = vmatprep.mubr.f32.mxu0 %v3960_v3  ;;  %v4363_v58 = vld [vmem:[%s4904_s3 + $0x20] sm:$0xff]  ;;  %v1006_v11 = vld [vmem:[%s4904_s3 + $0x30] sm:$0x3] }
 0x117   : > { %v3568_v16 = vpop.eup %3567  ;;  %3587 = vtanh.f32 %v922_v10  ;;  %v821_v17 = vadd.f32 %v820_v14, %v4269_v32  ;;  %v822_v18 = vpop.f32.mrb[23].mxu0  ;;  %3185 = vmatmul.mubr.msk.f32.vlgmr.msra.gmra.mrb[28].mxu1 %vm1049_vm2, %v4304_v1 }
 0x118   : > { %v3570_v20 = vpop.eup %3569  ;;  %3589 = vtanh.f32 %v924_v13  ;;  %v823_v19 = vadd.f32 %v822_v18, %v4269_v32  ;;  %v927_v21 = vpop.f32.mrb[22].mxu1  ;;  %1272 = vmatprep.mubr.f32.mxu1 %v3960_v3  ;;  %v3322_v22 = vpack.c.bf16 %v3568_v16, %v3560_v2 }
 0x119   : > { %v3572_v23 = vpop.eup %3571  ;;  %3591 = vtanh.f32 %v821_v17  ;;  %v928_v24 = vadd.f32 %v927_v21, %v4269_v32  ;;  %v929_v25 = vpop.f32.mrb[23].mxu1  ;;  %3177 = vmatmul.mubr.msk.f32.gmra.mrb[30].mxu0 %vm1049_vm2, %v4319_v15  ;;  %v3320_v26 = vpack.c.bf16 %v3570_v20, %v3562_v7 }
 0x11a   : > { %v3574_v27 = vpop.eup %3573  ;;  %3593 = vtanh.f32 %v823_v19  ;;  %v930_v28 = vadd.f32 %v929_v25, %v4269_v32  ;;  %v826_v29 = vpop.f32.mrb[24].mxu0  ;;  %1171 = vmatprep.mubr.f32.mxu0 %v3960_v3  ;;  %v3334_v31 = vpack.c.bf16 %v3572_v23, %v3564_v9 }
 0x11b   : > { %v3576_v33 = vpop.eup %3575  ;;  %3595 = vtanh.f32 %v928_v24  ;;  %v827_v34 = vadd.f32 %v826_v29, %v4275_v47  ;;  %v828_v35 = vpop.f32.mrb[25].mxu0  ;;  %3186 = vmatmul.mubr.msk.f32.gmra.mrb[30].mxu1 %vm1049_vm2, %v4319_v15  ;;  %3321 = vmatprep.subr.bf16.mxu0 %v3320_v26  ;;  %v3332_v36 = vpack.c.bf16 %v3574_v27, %v3566_v12 }
 0x11c   : > { %v3578_v32 = vpop.eup %3577  ;;  %3597 = vtanh.f32 %v930_v28  ;;  %v829_v37 = vadd.f32 %v828_v35, %v4275_v47  ;;  %v933_v38 = vpop.f32.mrb[24].mxu1  ;;  %3323 = vmatpush1.bf16.msra.mxu0 %v3322_v22  ;;  %1278 = vmatprep.mubr.f32.mxu1 %v3960_v3 }
 0x11d   : > { %v3580_v39 = vpop.eup %3579  ;;  %3599 = vtanh.f32 %v827_v34  ;;  %v934_v40 = vadd.f32 %v933_v38, %v4275_v47  ;;  %v935_v41 = vpop.f32.mrb[25].mxu1  ;;  %3178 = vmatmul.mubr.msk.f32.gmra.mrb[32].mxu0 %vm1049_vm2, %v4334_v30  ;;  %3333 = vmatprep.subr.bf16.mxu1 %v3332_v36 }
 0x11e   : > { %v3582_v42 = vpop.eup %3581  ;;  %3601 = vtanh.f32 %v829_v37  ;;  %v936_v43 = vadd.f32 %v935_v41, %v4275_v47  ;;  %v832_v44 = vpop.f32.mrb[26].mxu0  ;;  %3335 = vmatpush1.bf16.msra.mxu1 %v3334_v31  ;;  %1177 = vmatprep.mubr.f32.mxu0 %v3960_v3 }
 0x11f   : > { %v3584_v56 = vpop.eup %3583  ;;  %3603 = vtanh.f32 %v934_v40  ;;  %v834_v46 = vpop.f32.mrb[27].mxu0  ;;  %3187 = vmatmul.mubr.msk.f32.gmra.mrb[32].mxu1 %vm1049_vm2, %v4334_v30  ;;  %v833_v55 = vadd.f32 %v832_v44, %v4281_v63 }
 0x120   : > { %v3586_v48 = vpop.eup %3585  ;;  %3605 = vtanh.f32 %v936_v43  ;;  %v835_v49 = vadd.f32 %v834_v46, %v4281_v63  ;;  %v939_v47 = vpop.f32.mrb[26].mxu1  ;;  %1284 = vmatprep.mubr.f32.mxu1 %v3960_v3  ;;  %v3326_v50 = vpack.c.bf16 %v3584_v56, %v3576_v33 }
 0x121   : > { %v3588_v51 = vpop.eup %3587  ;;  %v941_v52 = vpop.f32.mrb[27].mxu1  ;;  %3179 = vmatmul.mubr.msk.f32.gmra.mrb[34].mxu0 %vm1049_vm2, %v4349_v45  ;;  %v3324_v53 = vpack.c.bf16 %v3586_v48, %v3578_v32  ;;  %v940_v62 = vadd.f32 %v939_v47, %v4281_v63 }
 0x122   : > { %v3590_v54 = vpop.eup %3589  ;;  %3607 = vtanh.f32 %v835_v49  ;;  %v942_v57 = vadd.f32 %v941_v52, %v4281_v63  ;;  %1183 = vmatprep.mubr.f32.mxu0 %v3960_v3  ;;  %v3338_v59 = vpack.c.bf16 %v3588_v51, %v3580_v39  ;;  %v4436_v25 = vpop.permute.xlu0 %1021 }
 0x123   : > { %v3592_v0 = vpop.eup %3591  ;;  %3188 = vmatmul.mubr.msk.f32.gmra.mrb[34].mxu1 %vm1049_vm2, %v4349_v45  ;;  %3325 = vmatprep.subr.bf16.mxu0 %v3324_v53  ;;  %v3336_v60 = vpack.c.bf16 %v3590_v54, %v3582_v42 }
 0x124   : > { %v3594_v61 = vpop.eup %3593  ;;  %3609 = vtanh.f32 %v942_v57  ;;  %3327 = vmatpush1.bf16.msra.mxu0 %v3326_v50  ;;  %1290 = vmatprep.mubr.f32.mxu1 %v3960_v3 }
 0x125   : > { %v3596_v2 = vpop.eup %3595  ;;  %3180 = vmatmul.mubr.msk.f32.gmra.mrb[36].mxu0 %vm1049_vm2, %v4363_v58  ;;  %3337 = vmatprep.subr.bf16.mxu1 %v3336_v60  ;;  %3611 = vtanh.f32 %v833_v55 }
 0x126   : > { %v3598_v4 = vpop.eup %3597  ;;  %3339 = vmatpush1.bf16.msra.mxu1 %v3338_v59  ;;  %1189 = vmatprep.mubr.f32.mxu0 %v3960_v3  ;;  %3613 = vtanh.f32 %v940_v62  ;;  %v4448_v43 = vpop.permute.xlu0 %1031 }
 0x127   : > { %v3600_v7 = vpop.eup %3599  ;;  %3189 = vmatmul.mubr.msk.f32.gmra.mrb[36].mxu1 %vm1049_vm2, %v4363_v58 }
 0x128   : > { %v3602_v63 = vpop.eup %3601  ;;  %1296 = vmatprep.mubr.f32.mxu1 %v3960_v3  ;;  %v3330_v8 = vpack.c.bf16 %v3600_v7, %v3592_v0 }
 0x129   : > { %v3604_v6 = vpop.eup %3603  ;;  %3181 = vmatmul.mubr.msk.f32.gmra.mrb[38].mxu0 %vm1049_vm2, %v1005_v5  ;;  %v3328_v9 = vpack.c.bf16 %v3602_v63, %v3594_v61 }
 0x12a   : > { %v3606_v10 = vpop.eup %3605  ;;  %1195 = vmatprep.mubr.f32.mxu0 %v3960_v3  ;;  %v3342_v12 = vpack.c.bf16 %v3604_v6, %v3596_v2 }
 0x12b   : > { %3190 = vmatmul.mubr.msk.f32.gmra.mrb[38].mxu1 %vm1049_vm2, %v1005_v5  ;;  %3329 = vmatprep.subr.bf16.mxu0 %v3328_v9  ;;  %v3340_v13 = vpack.c.bf16 %v3606_v10, %v3598_v4  ;;  %v4460_v9 = vpop.permute.xlu0 %1041 }
 0x12c   : > { %v3608_v14 = vpop.eup %3607  ;;  %3331 = vmatpush1.bf16.msra.mxu0 %v3330_v8  ;;  %1302 = vmatprep.mubr.f32.mxu1 %v3960_v3 }
 0x12d   : > { %3182 = vmatmul.mubr.msk.f32.gmra.mrb[40].mxu0 %vm1049_vm2, %v1006_v11  ;;  %3192 = vmatprep.subr.msk.mxu0 %vm499_vm0, %v3608_v14 }
 0x12e   : > { %v3610_v16 = vpop.eup %3609  ;;  %3341 = vmatprep.subr.bf16.mxu1 %v3340_v13  ;;  %1373 = vmatprep.mubr.f32.mxu0 %v3960_v3 }
 0x12f   : > { %3343 = vmatpush1.bf16.msra.mxu1 %v3342_v12  ;;  %v3612_v17 = vpop.eup %3611 }
 0x130   : > { %3191 = vmatmul.mubr.msk.f32.gmra.mrb[40].mxu1 %vm1049_vm2, %v1006_v11  ;;  %3201 = vmatprep.subr.msk.mxu1 %vm499_vm0, %v3610_v16  ;;  %v3614_v18 = vpop.eup %3613 }
 0x131   : > { %3193 = vmatpush1.msk.msra.mxu0 %vm499_vm0, %v3612_v17  ;;  %1480 = vmatprep.mubr.f32.mxu1 %v3960_v3 }
 0x132   : > { %3194 = vmatmul.mubr.msk.f32.vlgmr.msra.gmra.mrb[42].mxu0 %vm1049_vm2, %v4304_v1 }
 0x133   : > { %3202 = vmatpush1.msk.msra.mxu1 %vm499_vm0, %v3614_v18  ;;  %1379 = vmatprep.mubr.f32.mxu0 %v3960_v3 }
 0x134   : > { %3203 = vmatmul.mubr.msk.f32.vlgmr.msra.gmra.mrb[42].mxu1 %vm1049_vm2, %v4304_v1  ;;  %v4431_v1 = vpop.permute.xlu1 %1016 }
 0x135   : > { %1486 = vmatprep.mubr.f32.mxu1 %v3960_v3 }
 0x136   : > { %3195 = vmatmul.mubr.msk.f32.gmra.mrb[44].mxu0 %vm1049_vm2, %v4319_v15 }
 0x137   : > { %1385 = vmatprep.mubr.f32.mxu0 %v3960_v3 }
 0x138   : > { %3204 = vmatmul.mubr.msk.f32.gmra.mrb[44].mxu1 %vm1049_vm2, %v4319_v15  ;;  %v4442_v35 = vpop.permute.xlu1 %1026 }
 0x139   : > { %1492 = vmatprep.mubr.f32.mxu1 %v3960_v3 }
 0x13a   : > { %3196 = vmatmul.mubr.msk.f32.gmra.mrb[46].mxu0 %vm1049_vm2, %v4334_v30 }
 0x13b   : > { %1391 = vmatprep.mubr.f32.mxu0 %v3960_v3 }
 0x13c   : > { %3205 = vmatmul.mubr.msk.f32.gmra.mrb[46].mxu1 %vm1049_vm2, %v4334_v30  ;;  %v4454_v55 = vpop.permute.xlu1 %1036 }
 0x13d   : > { %1498 = vmatprep.mubr.f32.mxu1 %v3960_v3 }
 0x13e   : > { %3197 = vmatmul.mubr.msk.f32.gmra.mrb[48].mxu0 %vm1049_vm2, %v4349_v45 }
 0x13f   : > { %1397 = vmatprep.mubr.f32.mxu0 %v3960_v3 }
 0x140   : > { %3206 = vmatmul.mubr.msk.f32.gmra.mrb[48].mxu1 %vm1049_vm2, %v4349_v45 }
 0x141   : > { %1504 = vmatprep.mubr.f32.mxu1 %v3960_v3 }
 0x142   : > { %3198 = vmatmul.mubr.msk.f32.gmra.mrb[50].mxu0 %vm1049_vm2, %v4363_v58 }
 0x143   : > { %1403 = vmatprep.mubr.f32.mxu0 %v3960_v3 }
 0x144   : > { %3207 = vmatmul.mubr.msk.f32.gmra.mrb[50].mxu1 %vm1049_vm2, %v4363_v58 }
 0x145   : > { %1510 = vmatprep.mubr.f32.mxu1 %v3960_v3 }
 0x146   : > { %3199 = vmatmul.mubr.msk.f32.gmra.mrb[52].mxu0 %vm1049_vm2, %v1005_v5 }
 0x147   : > { %1409 = vmatprep.mubr.f32.mxu0 %v3960_v3 }
 0x148   : > { %3208 = vmatmul.mubr.msk.f32.gmra.mrb[52].mxu1 %vm1049_vm2, %v1005_v5 }
 0x149   : > { %1516 = vmatprep.mubr.f32.mxu1 %v3960_v3 }
 0x14a   : > { %3200 = vmatmul.mubr.msk.f32.gmra.mrb[54].mxu0 %vm1049_vm2, %v1006_v11 }
 0x14b   : > { %1737 = vmatprep.mubr.f32.mxu0 %v3960_v3 }
 0x14c   : > { %3209 = vmatmul.mubr.msk.f32.gmra.mrb[54].mxu1 %vm1049_vm2, %v1006_v11 }
 0x14d   : > { %1844 = vmatprep.mubr.f32.mxu1 %v3960_v3 }
 0x1e8   : > { %v1161_v15 = vpop.f32.mrb[28].mxu0 }
 0x1e9   : > { %v1162_v20 = vadd.f32 %v1161_v15, %v4431_v1  ;;  %v1163_v19 = vpop.f32.mrb[29].mxu0 }
 0x1ea   : > { %v1164_v21 = vadd.f32 %v1163_v19, %v4431_v1  ;;  %v1268_v22 = vpop.f32.mrb[28].mxu1 }
 0x1eb   : > { %3615 = vtanh.f32 %v1162_v20  ;;  %v1269_v23 = vadd.f32 %v1268_v22, %v4431_v1  ;;  %v1270_v24 = vpop.f32.mrb[29].mxu1 }
 0x1ec   : > { %3617 = vtanh.f32 %v1164_v21  ;;  %v1271_v26 = vadd.f32 %v1270_v24, %v4431_v1  ;;  %v1167_v27 = vpop.f32.mrb[30].mxu0  ;;  %v4466_v24 = vpop.permute.xlu1 %1046 }
 0x1ed   : > { %3619 = vtanh.f32 %v1269_v23  ;;  %v1168_v28 = vadd.f32 %v1167_v27, %v4436_v25  ;;  %v1169_v29 = vpop.f32.mrb[31].mxu0 }
 0x1ee   : > { %3621 = vtanh.f32 %v1271_v26  ;;  %v1170_v30 = vadd.f32 %v1169_v29, %v4436_v25  ;;  %v1274_v31 = vpop.f32.mrb[30].mxu1 }
 0x1ef   : > { %3623 = vtanh.f32 %v1168_v28  ;;  %v1275_v33 = vadd.f32 %v1274_v31, %v4436_v25  ;;  %v1276_v34 = vpop.f32.mrb[31].mxu1 }
 0x1f0   : > { %3625 = vtanh.f32 %v1170_v30  ;;  %v1277_v36 = vadd.f32 %v1276_v34, %v4436_v25  ;;  %v1173_v32 = vpop.f32.mrb[32].mxu0 }
 0x1f1   : > { %3627 = vtanh.f32 %v1275_v33  ;;  %v1174_v37 = vadd.f32 %v1173_v32, %v4442_v35  ;;  %v1175_v38 = vpop.f32.mrb[33].mxu0 }
 0x1f2   : > { %3629 = vtanh.f32 %v1277_v36  ;;  %v1176_v39 = vadd.f32 %v1175_v38, %v4442_v35  ;;  %v1280_v40 = vpop.f32.mrb[32].mxu1 }
 0x1f3   : > { %3631 = vtanh.f32 %v1174_v37  ;;  %v1281_v41 = vadd.f32 %v1280_v40, %v4442_v35  ;;  %v1282_v42 = vpop.f32.mrb[33].mxu1 }
 0x1f4   : > { %3633 = vtanh.f32 %v1176_v39  ;;  %v1283_v44 = vadd.f32 %v1282_v42, %v4442_v35  ;;  %v1179_v45 = vpop.f32.mrb[34].mxu0 }
 0x1f5   : > { %v3616_v56 = vpop.eup %3615  ;;  %3635 = vtanh.f32 %v1281_v41  ;;  %v1180_v46 = vadd.f32 %v1179_v45, %v4448_v43  ;;  %v1181_v48 = vpop.f32.mrb[35].mxu0 }
 0x1f6   : > { %v3618_v49 = vpop.eup %3617  ;;  %3637 = vtanh.f32 %v1283_v44  ;;  %v1182_v47 = vadd.f32 %v1181_v48, %v4448_v43  ;;  %v1286_v50 = vpop.f32.mrb[34].mxu1 }
 0x1f7   : > { %v3620_v51 = vpop.eup %3619  ;;  %3639 = vtanh.f32 %v1180_v46  ;;  %v1287_v52 = vadd.f32 %v1286_v50, %v4448_v43  ;;  %v1288_v53 = vpop.f32.mrb[35].mxu1 }
 0x1f8   : > { %v3622_v54 = vpop.eup %3621  ;;  %3641 = vtanh.f32 %v1182_v47  ;;  %v1289_v57 = vadd.f32 %v1288_v53, %v4448_v43  ;;  %v1185_v58 = vpop.f32.mrb[36].mxu0 }
 0x1f9   : > { %v3624_v59 = vpop.eup %3623  ;;  %3643 = vtanh.f32 %v1287_v52  ;;  %v1186_v0 = vadd.f32 %v1185_v58, %v4454_v55  ;;  %v1187_v60 = vpop.f32.mrb[37].mxu0 }
 0x1fa   : > { %v3626_v61 = vpop.eup %3625  ;;  %3645 = vtanh.f32 %v1289_v57  ;;  %v1188_v62 = vadd.f32 %v1187_v60, %v4454_v55  ;;  %v1292_v2 = vpop.f32.mrb[36].mxu1  ;;  %v3346_v4 = vpack.c.bf16 %v3624_v59, %v3616_v56 }
 0x1fb   : > { %v3628_v5 = vpop.eup %3627  ;;  %3647 = vtanh.f32 %v1186_v0  ;;  %v1293_v7 = vadd.f32 %v1292_v2, %v4454_v55  ;;  %v1294_v63 = vpop.f32.mrb[37].mxu1  ;;  %v3344_v8 = vpack.c.bf16 %v3626_v61, %v3618_v49 }
 0x1fc   : > { %v3630_v6 = vpop.eup %3629  ;;  %3649 = vtanh.f32 %v1188_v62  ;;  %v1295_v10 = vadd.f32 %v1294_v63, %v4454_v55  ;;  %v1191_v11 = vpop.f32.mrb[38].mxu0  ;;  %v3358_v12 = vpack.c.bf16 %v3628_v5, %v3620_v51 }
 0x1fd   : > { %v3632_v13 = vpop.eup %3631  ;;  %3651 = vtanh.f32 %v1293_v7  ;;  %v1192_v14 = vadd.f32 %v1191_v11, %v4460_v9  ;;  %v1193_v16 = vpop.f32.mrb[39].mxu0  ;;  %3345 = vmatprep.subr.bf16.mxu0 %v3344_v8  ;;  %v3356_v17 = vpack.c.bf16 %v3630_v6, %v3622_v54 }
 0x1fe   : > { %v3634_v18 = vpop.eup %3633  ;;  %3653 = vtanh.f32 %v1295_v10  ;;  %v1194_v15 = vadd.f32 %v1193_v16, %v4460_v9  ;;  %v1298_v20 = vpop.f32.mrb[38].mxu1  ;;  %3347 = vmatpush1.bf16.msra.mxu0 %v3346_v4 }
 0x1ff   : > { %v3636_v19 = vpop.eup %3635  ;;  %3655 = vtanh.f32 %v1192_v14  ;;  %v1299_v21 = vadd.f32 %v1298_v20, %v4460_v9  ;;  %v1300_v22 = vpop.f32.mrb[39].mxu1  ;;  %3357 = vmatprep.subr.bf16.mxu1 %v3356_v17 }
 0x200   : > { %v3638_v23 = vpop.eup %3637  ;;  %3657 = vtanh.f32 %v1194_v15  ;;  %v1301_v26 = vadd.f32 %v1300_v22, %v4460_v9  ;;  %v1197_v27 = vpop.f32.mrb[40].mxu0  ;;  %3359 = vmatpush1.bf16.msra.mxu1 %v3358_v12 }
 0x201   : > { %v3640_v28 = vpop.eup %3639  ;;  %3659 = vtanh.f32 %v1299_v21  ;;  %v1198_v29 = vadd.f32 %v1197_v27, %v4466_v24  ;;  %v1199_v30 = vpop.f32.mrb[41].mxu0  ;;  %v4488_v21 = vld [vmem:[%s4906_s5] sm:$0xff] }
 0x202   : > { %v3642_v31 = vpop.eup %3641  ;;  %3661 = vtanh.f32 %v1301_v26  ;;  %v1200_v33 = vadd.f32 %v1199_v30, %v4466_v24  ;;  %v3350_v34 = vpack.c.bf16 %v3640_v28, %v3632_v13 }
 0x203   : > { %v3644_v36 = vpop.eup %3643  ;;  %v1304_v32 = vpop.f32.mrb[40].mxu1  ;;  %v3348_v37 = vpack.c.bf16 %v3642_v31, %v3634_v18 }
 0x204   : > { %v3646_v38 = vpop.eup %3645  ;;  %3663 = vtanh.f32 %v1200_v33  ;;  %v1305_v39 = vadd.f32 %v1304_v32, %v4466_v24  ;;  %v1306_v40 = vpop.f32.mrb[41].mxu1  ;;  %v3362_v41 = vpack.c.bf16 %v3644_v36, %v3636_v19  ;;  %v4503_v32 = vld [vmem:[%s4906_s5 + $0x8] sm:$0xff] }
 0x205   : > { %v3648_v42 = vpop.eup %3647  ;;  %3665 = vtanh.f32 %v1198_v29  ;;  %v1307_v44 = vadd.f32 %v1306_v40, %v4466_v24  ;;  %v1375_v45 = vpop.f32.mrb[42].mxu0  ;;  %3349 = vmatprep.subr.bf16.mxu0 %v3348_v37  ;;  %v3360_v56 = vpack.c.bf16 %v3646_v38, %v3638_v23 }
 0x206   : > { %v3650_v46 = vpop.eup %3649  ;;  %3667 = vtanh.f32 %v1305_v39  ;;  %v1376_v48 = vadd.f32 %v1375_v45, %v4431_v1  ;;  %v1377_v49 = vpop.f32.mrb[43].mxu0  ;;  %3351 = vmatpush1.bf16.msra.mxu0 %v3350_v34 }
 0x207   : > { %v3652_v47 = vpop.eup %3651  ;;  %3669 = vtanh.f32 %v1307_v44  ;;  %v1378_v50 = vadd.f32 %v1377_v49, %v4431_v1  ;;  %v1482_v51 = vpop.f32.mrb[42].mxu1  ;;  %3361 = vmatprep.subr.bf16.mxu1 %v3360_v56 }
 0x208   : > { %v3654_v52 = vpop.eup %3653  ;;  %3671 = vtanh.f32 %v1376_v48  ;;  %v1483_v53 = vadd.f32 %v1482_v51, %v4431_v1  ;;  %v1484_v54 = vpop.f32.mrb[43].mxu1  ;;  %3363 = vmatpush1.bf16.msra.mxu1 %v3362_v41 }
 0x209   : > { %v3656_v57 = vpop.eup %3655  ;;  %3673 = vtanh.f32 %v1378_v50  ;;  %v1485_v58 = vadd.f32 %v1484_v54, %v4431_v1  ;;  %v1381_v59 = vpop.f32.mrb[44].mxu0 }
 0x20a   : > { %v3658_v0 = vpop.eup %3657  ;;  %3675 = vtanh.f32 %v1483_v53  ;;  %v1382_v60 = vadd.f32 %v1381_v59, %v4436_v25  ;;  %v1383_v61 = vpop.f32.mrb[45].mxu0  ;;  %v3354_v62 = vpack.c.bf16 %v3656_v57, %v3648_v42  ;;  %v4521_v53 = vld [vmem:[%s4906_s5 + $0x10] sm:$0xff] }
 0x20b   : > { %v3660_v2 = vpop.eup %3659  ;;  %3677 = vtanh.f32 %v1485_v58  ;;  %v1384_v4 = vadd.f32 %v1383_v61, %v4436_v25  ;;  %v1488_v5 = vpop.f32.mrb[44].mxu1  ;;  %v3352_v7 = vpack.c.bf16 %v3658_v0, %v3650_v46 }
 0x20c   : > { %v3662_v63 = vpop.eup %3661  ;;  %3679 = vtanh.f32 %v1382_v60  ;;  %v1489_v8 = vadd.f32 %v1488_v5, %v4436_v25  ;;  %v1490_v6 = vpop.f32.mrb[45].mxu1  ;;  %v3366_v10 = vpack.c.bf16 %v3660_v2, %v3652_v47 }
 0x20d   : > { %3681 = vtanh.f32 %v1384_v4  ;;  %v1491_v1 = vadd.f32 %v1490_v6, %v4436_v25  ;;  %v1387_v11 = vpop.f32.mrb[46].mxu0  ;;  %3353 = vmatprep.subr.bf16.mxu0 %v3352_v7  ;;  %v3364_v12 = vpack.c.bf16 %v3662_v63, %v3654_v52 }
 0x20e   : > { %v3664_v13 = vpop.eup %3663  ;;  %3683 = vtanh.f32 %v1489_v8  ;;  %v1388_v14 = vadd.f32 %v1387_v11, %v4442_v35  ;;  %v1389_v16 = vpop.f32.mrb[47].mxu0  ;;  %3355 = vmatpush1.bf16.msra.mxu0 %v3354_v62  ;;  %v4534_v8 = vld [vmem:[%s4906_s5 + $0x18] sm:$0xff] }
 0x20f   : > { %v3666_v17 = vpop.eup %3665  ;;  %3685 = vtanh.f32 %v1491_v1  ;;  %v1390_v18 = vadd.f32 %v1389_v16, %v4442_v35  ;;  %v1494_v15 = vpop.f32.mrb[46].mxu1  ;;  %3210 = vmatprep.subr.msk.mxu0 %vm499_vm0, %v3664_v13  ;;  %3365 = vmatprep.subr.bf16.mxu1 %v3364_v12 }
 0x210   : > { %v3668_v20 = vpop.eup %3667  ;;  %3687 = vtanh.f32 %v1388_v14  ;;  %v1495_v25 = vadd.f32 %v1494_v15, %v4442_v35  ;;  %v1496_v19 = vpop.f32.mrb[47].mxu1  ;;  %3367 = vmatpush1.bf16.msra.mxu1 %v3366_v10 }
 0x211   : > { %v3670_v22 = vpop.eup %3669  ;;  %3689 = vtanh.f32 %v1390_v18  ;;  %v1497_v23 = vadd.f32 %v1496_v19, %v4442_v35  ;;  %v1393_v26 = vpop.f32.mrb[48].mxu0 }
 0x212   : > { %v3672_v27 = vpop.eup %3671  ;;  %3691 = vtanh.f32 %v1495_v25  ;;  %v1394_v28 = vadd.f32 %v1393_v26, %v4448_v43  ;;  %v1395_v29 = vpop.f32.mrb[49].mxu0  ;;  %3219 = vmatprep.subr.msk.mxu1 %vm499_vm0, %v3670_v22  ;;  %3211 = vmatpush1.msk.msra.mxu0 %vm499_vm0, %v3666_v17 }
 0x213   : > { %v3674_v30 = vpop.eup %3673  ;;  %3693 = vtanh.f32 %v1497_v23  ;;  %v1396_v31 = vadd.f32 %v1395_v29, %v4448_v43  ;;  %v1500_v33 = vpop.f32.mrb[48].mxu1  ;;  %3212 = vmatmul.mubr.msk.f32.vlgmr.msra.gmra.mrb[56].mxu0 %vm1049_vm2, %v4488_v21  ;;  %v1584_v29 = vld [vmem:[%s4906_s5 + $0x28] sm:$0xff] }
 0x214   : > { %v3676_v34 = vpop.eup %3675  ;;  %3695 = vtanh.f32 %v1394_v28  ;;  %v1501_v35 = vadd.f32 %v1500_v33, %v4448_v43  ;;  %v1502_v36 = vpop.f32.mrb[49].mxu1  ;;  %3220 = vmatpush1.msk.msra.mxu1 %vm499_vm0, %v3668_v20  ;;  %1743 = vmatprep.mubr.f32.mxu0 %v3960_v3  ;;  %v4548_v20 = vld [vmem:[%s4906_s5 + $0x20] sm:$0xff] }
 0x215   : > { %v3678_v37 = vpop.eup %3677  ;;  %3697 = vtanh.f32 %v1396_v31  ;;  %v1503_v38 = vadd.f32 %v1502_v36, %v4448_v43  ;;  %v1399_v39 = vpop.f32.mrb[50].mxu0  ;;  %3221 = vmatmul.mubr.msk.f32.vlgmr.msra.gmra.mrb[56].mxu1 %vm1049_vm2, %v4488_v21  ;;  %v1585_v36 = vld [vmem:[%s4906_s5 + $0x30] sm:$0x3] }
 0x216   : > { %v3680_v40 = vpop.eup %3679  ;;  %3699 = vtanh.f32 %v1501_v35  ;;  %v1400_v41 = vadd.f32 %v1399_v39, %v4454_v55  ;;  %v1401_v42 = vpop.f32.mrb[51].mxu0  ;;  %1850 = vmatprep.mubr.f32.mxu1 %v3960_v3 }
 0x217   : > { %v3682_v44 = vpop.eup %3681  ;;  %3701 = vtanh.f32 %v1503_v38  ;;  %v1402_v45 = vadd.f32 %v1401_v42, %v4454_v55  ;;  %v1506_v56 = vpop.f32.mrb[50].mxu1  ;;  %3213 = vmatmul.mubr.msk.f32.gmra.mrb[58].mxu0 %vm1049_vm2, %v4503_v32  ;;  %v3370_v43 = vpack.c.bf16 %v3680_v40, %v3672_v27 }
 0x218   : > { %v3684_v46 = vpop.eup %3683  ;;  %3703 = vtanh.f32 %v1400_v41  ;;  %v1507_v48 = vadd.f32 %v1506_v56, %v4454_v55  ;;  %v1508_v49 = vpop.f32.mrb[51].mxu1  ;;  %v3368_v47 = vpack.c.bf16 %v3682_v44, %v3674_v30  ;;  %1749 = vmatprep.mubr.f32.mxu0 %v3960_v3 }
 0x219   : > { %v3686_v50 = vpop.eup %3685  ;;  %3705 = vtanh.f32 %v1402_v45  ;;  %v1509_v51 = vadd.f32 %v1508_v49, %v4454_v55  ;;  %v1405_v52 = vpop.f32.mrb[52].mxu0  ;;  %3222 = vmatmul.mubr.msk.f32.gmra.mrb[58].mxu1 %vm1049_vm2, %v4503_v32  ;;  %v3382_v54 = vpack.c.bf16 %v3684_v46, %v3676_v34 }
 0x21a   : > { %v3688_v57 = vpop.eup %3687  ;;  %3707 = vtanh.f32 %v1507_v48  ;;  %v1406_v58 = vadd.f32 %v1405_v52, %v4460_v9  ;;  %v1407_v59 = vpop.f32.mrb[53].mxu0  ;;  %3369 = vmatprep.subr.bf16.mxu0 %v3368_v47  ;;  %v3380_v0 = vpack.c.bf16 %v3686_v50, %v3678_v37  ;;  %1856 = vmatprep.mubr.f32.mxu1 %v3960_v3 }
 0x21b   : > { %v3690_v55 = vpop.eup %3689  ;;  %3709 = vtanh.f32 %v1509_v51  ;;  %v1408_v60 = vadd.f32 %v1407_v59, %v4460_v9  ;;  %v1512_v61 = vpop.f32.mrb[52].mxu1  ;;  %3371 = vmatpush1.bf16.msra.mxu0 %v3370_v43 }
 0x21c   : > { %v3692_v62 = vpop.eup %3691  ;;  %3711 = vtanh.f32 %v1406_v58  ;;  %v1513_v2 = vadd.f32 %v1512_v61, %v4460_v9  ;;  %v1514_v4 = vpop.f32.mrb[53].mxu1  ;;  %3214 = vmatmul.mubr.msk.f32.gmra.mrb[60].mxu0 %vm1049_vm2, %v4521_v53  ;;  %3381 = vmatprep.subr.bf16.mxu1 %v3380_v0 }
 0x21d   : > { %v3694_v5 = vpop.eup %3693  ;;  %3713 = vtanh.f32 %v1408_v60  ;;  %v1515_v7 = vadd.f32 %v1514_v4, %v4460_v9  ;;  %v1411_v63 = vpop.f32.mrb[54].mxu0  ;;  %3383 = vmatpush1.bf16.msra.mxu1 %v3382_v54  ;;  %1755 = vmatprep.mubr.f32.mxu0 %v3960_v3 }
 0x21e   : > { %v3696_v6 = vpop.eup %3695  ;;  %3715 = vtanh.f32 %v1513_v2  ;;  %v1413_v10 = vpop.f32.mrb[55].mxu0  ;;  %3223 = vmatmul.mubr.msk.f32.gmra.mrb[60].mxu1 %vm1049_vm2, %v4521_v53  ;;  %v1412_v18 = vadd.f32 %v1411_v63, %v4466_v24 }
 0x21f   : > { %v3698_v1 = vpop.eup %3697  ;;  %3717 = vtanh.f32 %v1515_v7  ;;  %v1414_v11 = vadd.f32 %v1413_v10, %v4466_v24  ;;  %v1518_v9 = vpop.f32.mrb[54].mxu1  ;;  %1862 = vmatprep.mubr.f32.mxu1 %v3960_v3  ;;  %v3374_v12 = vpack.c.bf16 %v3696_v6, %v3688_v57 }
 0x220   : > { %v3700_v13 = vpop.eup %3699  ;;  %v1520_v14 = vpop.f32.mrb[55].mxu1  ;;  %3215 = vmatmul.mubr.msk.f32.gmra.mrb[62].mxu0 %vm1049_vm2, %v4534_v8  ;;  %v3372_v16 = vpack.c.bf16 %v3698_v1, %v3690_v55  ;;  %v1519_v26 = vadd.f32 %v1518_v9, %v4466_v24 }
 0x221   : > { %v3702_v17 = vpop.eup %3701  ;;  %3719 = vtanh.f32 %v1414_v11  ;;  %v1521_v15 = vadd.f32 %v1520_v14, %v4466_v24  ;;  %1761 = vmatprep.mubr.f32.mxu0 %v3960_v3  ;;  %v3386_v25 = vpack.c.bf16 %v3700_v13, %v3692_v62  ;;  %v4621_v49 = vpop.permute.xlu1 %1600 }
 0x222   : > { %v3704_v19 = vpop.eup %3703  ;;  %3224 = vmatmul.mubr.msk.f32.gmra.mrb[62].mxu1 %vm1049_vm2, %v4534_v8  ;;  %3373 = vmatprep.subr.bf16.mxu0 %v3372_v16  ;;  %v3384_v22 = vpack.c.bf16 %v3702_v17, %v3694_v5 }
 0x223   : > { %v3706_v23 = vpop.eup %3705  ;;  %3721 = vtanh.f32 %v1521_v15  ;;  %3375 = vmatpush1.bf16.msra.mxu0 %v3374_v12  ;;  %1868 = vmatprep.mubr.f32.mxu1 %v3960_v3 }
 0x224   : > { %v3708_v27 = vpop.eup %3707  ;;  %3216 = vmatmul.mubr.msk.f32.gmra.mrb[64].mxu0 %vm1049_vm2, %v4548_v20  ;;  %3385 = vmatprep.subr.bf16.mxu1 %v3384_v22  ;;  %3723 = vtanh.f32 %v1412_v18 }
 0x225   : > { %v3710_v28 = vpop.eup %3709  ;;  %3387 = vmatpush1.bf16.msra.mxu1 %v3386_v25  ;;  %1767 = vmatprep.mubr.f32.mxu0 %v3960_v3  ;;  %3725 = vtanh.f32 %v1519_v26  ;;  %v4633_v63 = vpop.permute.xlu1 %1610 }
 0x226   : > { %v3712_v30 = vpop.eup %3711  ;;  %3225 = vmatmul.mubr.msk.f32.gmra.mrb[64].mxu1 %vm1049_vm2, %v4548_v20 }
 0x227   : > { %v3714_v24 = vpop.eup %3713  ;;  %1874 = vmatprep.mubr.f32.mxu1 %v3960_v3  ;;  %v3378_v31 = vpack.c.bf16 %v3712_v30, %v3704_v19 }
 0x228   : > { %v3716_v33 = vpop.eup %3715  ;;  %3217 = vmatmul.mubr.msk.f32.gmra.mrb[66].mxu0 %vm1049_vm2, %v1584_v29  ;;  %v3376_v34 = vpack.c.bf16 %v3714_v24, %v3706_v23 }
 0x229   : > { %v3718_v35 = vpop.eup %3717  ;;  %1773 = vmatprep.mubr.f32.mxu0 %v3960_v3  ;;  %v3390_v37 = vpack.c.bf16 %v3716_v33, %v3708_v27 }
 0x22a   : > { %3226 = vmatmul.mubr.msk.f32.gmra.mrb[66].mxu1 %vm1049_vm2, %v1584_v29  ;;  %3377 = vmatprep.subr.bf16.mxu0 %v3376_v34  ;;  %v3388_v38 = vpack.c.bf16 %v3718_v35, %v3710_v28  ;;  %v4645_v35 = vpop.permute.xlu1 %1620 }
 0x22b   : > { %v3720_v39 = vpop.eup %3719  ;;  %3379 = vmatpush1.bf16.msra.mxu0 %v3378_v31  ;;  %1880 = vmatprep.mubr.f32.mxu1 %v3960_v3 }
 0x22c   : > { %3218 = vmatmul.mubr.msk.f32.gmra.mrb[68].mxu0 %vm1049_vm2, %v1585_v36  ;;  %3228 = vmatprep.subr.msk.mxu0 %vm499_vm0, %v3720_v39 }
 0x22d   : > { %v3722_v40 = vpop.eup %3721  ;;  %3389 = vmatprep.subr.bf16.mxu1 %v3388_v38  ;;  %1951 = vmatprep.mubr.f32.mxu0 %v3960_v3 }
 0x22e   : > { %3391 = vmatpush1.bf16.msra.mxu1 %v3390_v37  ;;  %v3724_v41 = vpop.eup %3723 }
 0x22f   : > { %3227 = vmatmul.mubr.msk.f32.gmra.mrb[68].mxu1 %vm1049_vm2, %v1585_v36  ;;  %3237 = vmatprep.subr.msk.mxu1 %vm499_vm0, %v3722_v40  ;;  %v3726_v42 = vpop.eup %3725 }
 0x230   : > { %3229 = vmatpush1.msk.msra.mxu0 %vm499_vm0, %v3724_v41  ;;  %2058 = vmatprep.mubr.f32.mxu1 %v3960_v3 }
 0x231   : > { %3230 = vmatmul.mubr.msk.f32.vlgmr.msra.gmra.mrb[70].mxu0 %vm1049_vm2, %v4488_v21 }
 0x232   : > { %3238 = vmatpush1.msk.msra.mxu1 %vm499_vm0, %v3726_v42  ;;  %1957 = vmatprep.mubr.f32.mxu0 %v3960_v3 }
 0x233   : > { %3239 = vmatmul.mubr.msk.f32.vlgmr.msra.gmra.mrb[70].mxu1 %vm1049_vm2, %v4488_v21  ;;  %v4616_v21 = vpop.permute.xlu0 %1595 }
 0x234   : > { %2064 = vmatprep.mubr.f32.mxu1 %v3960_v3 }
 0x235   : > { %3231 = vmatmul.mubr.msk.f32.gmra.mrb[72].mxu0 %vm1049_vm2, %v4503_v32 }
 0x236   : > { %1963 = vmatprep.mubr.f32.mxu0 %v3960_v3 }
 0x237   : > { %3240 = vmatmul.mubr.msk.f32.gmra.mrb[72].mxu1 %vm1049_vm2, %v4503_v32  ;;  %v4628_v0 = vpop.permute.xlu0 %1605 }
 0x238   : > { %2070 = vmatprep.mubr.f32.mxu1 %v3960_v3 }
 0x239   : > { %3232 = vmatmul.mubr.msk.f32.gmra.mrb[74].mxu0 %vm1049_vm2, %v4521_v53 }
 0x23a   : > { %1969 = vmatprep.mubr.f32.mxu0 %v3960_v3 }
 0x23b   : > { %3241 = vmatmul.mubr.msk.f32.gmra.mrb[74].mxu1 %vm1049_vm2, %v4521_v53  ;;  %v4639_v15 = vpop.permute.xlu0 %1615 }
 0x23c   : > { %2076 = vmatprep.mubr.f32.mxu1 %v3960_v3 }
 0x23d   : > { %3233 = vmatmul.mubr.msk.f32.gmra.mrb[76].mxu0 %vm1049_vm2, %v4534_v8 }
 0x23e   : > { %1975 = vmatprep.mubr.f32.mxu0 %v3960_v3 }
 0x23f   : > { %3242 = vmatmul.mubr.msk.f32.gmra.mrb[76].mxu1 %vm1049_vm2, %v4534_v8 }
 0x240   : > { %2082 = vmatprep.mubr.f32.mxu1 %v3960_v3 }
 0x241   : > { %3234 = vmatmul.mubr.msk.f32.gmra.mrb[78].mxu0 %vm1049_vm2, %v4548_v20 }
 0x242   : > { %1981 = vmatprep.mubr.f32.mxu0 %v3960_v3 }
 0x243   : > { %3243 = vmatmul.mubr.msk.f32.gmra.mrb[78].mxu1 %vm1049_vm2, %v4548_v20 }
 0x244   : > { %2088 = vmatprep.mubr.f32.mxu1 %v3960_v3 }
 0x245   : > { %3235 = vmatmul.mubr.msk.f32.gmra.mrb[80].mxu0 %vm1049_vm2, %v1584_v29 }
 0x246   : > { %1987 = vmatprep.mubr.f32.mxu0 %v3960_v3 }
 0x247   : > { %3244 = vmatmul.mubr.msk.f32.gmra.mrb[80].mxu1 %vm1049_vm2, %v1584_v29 }
 0x248   : > { %2094 = vmatprep.mubr.f32.mxu1 %v3960_v3 }
 0x249   : > { %3236 = vmatmul.mubr.msk.f32.gmra.mrb[82].mxu0 %vm1049_vm2, %v1585_v36 }
 0x24a   : > { %2315 = vmatprep.mubr.f32.mxu0 %v3960_v3 }
 0x24b   : > { %3245 = vmatmul.mubr.msk.f32.gmra.mrb[82].mxu1 %vm1049_vm2, %v1585_v36 }
 0x24c   : > { %2422 = vmatprep.mubr.f32.mxu1 %v3960_v3 }
 0x2e6   : > { %v1739_v32 = vpop.f32.mrb[56].mxu0 }
 0x2e7   : > { %v1740_v44 = vadd.f32 %v1739_v32, %v4616_v21  ;;  %v1741_v45 = vpop.f32.mrb[57].mxu0 }
 0x2e8   : > { %v1742_v56 = vadd.f32 %v1741_v45, %v4616_v21  ;;  %v1846_v43 = vpop.f32.mrb[56].mxu1 }
 0x2e9   : > { %3727 = vtanh.f32 %v1740_v44  ;;  %v1847_v46 = vadd.f32 %v1846_v43, %v4616_v21  ;;  %v1848_v48 = vpop.f32.mrb[57].mxu1 }
 0x2ea   : > { %3729 = vtanh.f32 %v1742_v56  ;;  %v1849_v47 = vadd.f32 %v1848_v48, %v4616_v21  ;;  %v1745_v50 = vpop.f32.mrb[58].mxu0  ;;  %v4651_v48 = vpop.permute.xlu0 %1625 }
 0x2eb   : > { %3731 = vtanh.f32 %v1847_v46  ;;  %v1746_v51 = vadd.f32 %v1745_v50, %v4621_v49  ;;  %v1747_v52 = vpop.f32.mrb[59].mxu0 }
 0x2ec   : > { %3733 = vtanh.f32 %v1849_v47  ;;  %v1748_v53 = vadd.f32 %v1747_v52, %v4621_v49  ;;  %v1852_v54 = vpop.f32.mrb[58].mxu1 }
 0x2ed   : > { %3735 = vtanh.f32 %v1746_v51  ;;  %v1853_v57 = vadd.f32 %v1852_v54, %v4621_v49  ;;  %v1854_v58 = vpop.f32.mrb[59].mxu1 }
 0x2ee   : > { %3737 = vtanh.f32 %v1748_v53  ;;  %v1855_v59 = vadd.f32 %v1854_v58, %v4621_v49 }
 0x2ef   : > { %3739 = vtanh.f32 %v1853_v57  ;;  %v1751_v55 = vpop.f32.mrb[60].mxu0 }
 0x2f0   : > { %3741 = vtanh.f32 %v1855_v59  ;;  %v1752_v60 = vadd.f32 %v1751_v55, %v4628_v0  ;;  %v1753_v61 = vpop.f32.mrb[61].mxu0 }
 0x2f1   : > { %v1754_v62 = vadd.f32 %v1753_v61, %v4628_v0  ;;  %v1858_v2 = vpop.f32.mrb[60].mxu1 }
 0x2f2   : > { %3743 = vtanh.f32 %v1752_v60  ;;  %v1859_v4 = vadd.f32 %v1858_v2, %v4628_v0  ;;  %v1860_v5 = vpop.f32.mrb[61].mxu1 }
 0x2f3   : > { %v3728_v7 = vpop.eup %3727  ;;  %3745 = vtanh.f32 %v1754_v62  ;;  %v1861_v8 = vadd.f32 %v1860_v5, %v4628_v0  ;;  %v1757_v6 = vpop.f32.mrb[62].mxu0 }
 0x2f4   : > { %v3730_v10 = vpop.eup %3729  ;;  %3747 = vtanh.f32 %v1859_v4  ;;  %v1758_v1 = vadd.f32 %v1757_v6, %v4633_v63  ;;  %v1759_v11 = vpop.f32.mrb[63].mxu0 }
 0x2f5   : > { %v3732_v9 = vpop.eup %3731  ;;  %3749 = vtanh.f32 %v1861_v8  ;;  %v1760_v12 = vadd.f32 %v1759_v11, %v4633_v63  ;;  %v1864_v13 = vpop.f32.mrb[62].mxu1 }
 0x2f6   : > { %v3734_v14 = vpop.eup %3733  ;;  %3751 = vtanh.f32 %v1758_v1  ;;  %v1865_v16 = vadd.f32 %v1864_v13, %v4633_v63  ;;  %v1866_v17 = vpop.f32.mrb[63].mxu1 }
 0x2f7   : > { %v3736_v18 = vpop.eup %3735  ;;  %3753 = vtanh.f32 %v1760_v12  ;;  %v1867_v20 = vadd.f32 %v1866_v17, %v4633_v63  ;;  %v1763_v25 = vpop.f32.mrb[64].mxu0 }
 0x2f8   : > { %v3738_v19 = vpop.eup %3737  ;;  %3755 = vtanh.f32 %v1865_v16  ;;  %v1764_v22 = vadd.f32 %v1763_v25, %v4639_v15  ;;  %v1765_v23 = vpop.f32.mrb[65].mxu0  ;;  %v3394_v26 = vpack.c.bf16 %v3736_v18, %v3728_v7 }
 0x2f9   : > { %v3740_v27 = vpop.eup %3739  ;;  %3757 = vtanh.f32 %v1867_v20  ;;  %v1766_v28 = vadd.f32 %v1765_v23, %v4639_v15  ;;  %v1870_v29 = vpop.f32.mrb[64].mxu1  ;;  %v3392_v30 = vpack.c.bf16 %v3738_v19, %v3730_v10 }
 0x2fa   : > { %v3742_v24 = vpop.eup %3741  ;;  %3759 = vtanh.f32 %v1764_v22  ;;  %v1871_v31 = vadd.f32 %v1870_v29, %v4639_v15  ;;  %v1872_v33 = vpop.f32.mrb[65].mxu1  ;;  %v3406_v34 = vpack.c.bf16 %v3740_v27, %v3732_v9 }
 0x2fb   : > { %3761 = vtanh.f32 %v1766_v28  ;;  %v1873_v36 = vadd.f32 %v1872_v33, %v4639_v15  ;;  %v1769_v37 = vpop.f32.mrb[66].mxu0  ;;  %3393 = vmatprep.subr.bf16.mxu0 %v3392_v30  ;;  %v3404_v38 = vpack.c.bf16 %v3742_v24, %v3734_v14 }
 0x2fc   : > { %v3744_v39 = vpop.eup %3743  ;;  %3763 = vtanh.f32 %v1871_v31  ;;  %v1770_v40 = vadd.f32 %v1769_v37, %v4645_v35  ;;  %v1771_v41 = vpop.f32.mrb[67].mxu0  ;;  %3395 = vmatpush1.bf16.msra.mxu0 %v3394_v26 }
 0x2fd   : > { %v3746_v42 = vpop.eup %3745  ;;  %3765 = vtanh.f32 %v1873_v36  ;;  %v1772_v32 = vadd.f32 %v1771_v41, %v4645_v35  ;;  %v1876_v44 = vpop.f32.mrb[66].mxu1  ;;  %3405 = vmatprep.subr.bf16.mxu1 %v3404_v38 }
 0x2fe   : > { %v3748_v45 = vpop.eup %3747  ;;  %3767 = vtanh.f32 %v1770_v40  ;;  %v1877_v56 = vadd.f32 %v1876_v44, %v4645_v35  ;;  %v1878_v43 = vpop.f32.mrb[67].mxu1  ;;  %3407 = vmatpush1.bf16.msra.mxu1 %v3406_v34 }
 0x2ff   : > { %v3750_v46 = vpop.eup %3749  ;;  %3769 = vtanh.f32 %v1772_v32  ;;  %v1879_v47 = vadd.f32 %v1878_v43, %v4645_v35  ;;  %v1775_v50 = vpop.f32.mrb[68].mxu0 }
 0x300   : > { %v3752_v51 = vpop.eup %3751  ;;  %3771 = vtanh.f32 %v1877_v56  ;;  %v1776_v52 = vadd.f32 %v1775_v50, %v4651_v48  ;;  %v1777_v53 = vpop.f32.mrb[69].mxu0  ;;  %v4673_v56 = vld [vmem:[%s4908_s7] sm:$0xff] }
 0x301   : > { %v3754_v54 = vpop.eup %3753  ;;  %3773 = vtanh.f32 %v1879_v47  ;;  %v1778_v57 = vadd.f32 %v1777_v53, %v4651_v48  ;;  %v3398_v58 = vpack.c.bf16 %v3752_v51, %v3744_v39 }
 0x302   : > { %v3756_v59 = vpop.eup %3755  ;;  %v1882_v55 = vpop.f32.mrb[68].mxu1  ;;  %v3396_v60 = vpack.c.bf16 %v3754_v54, %v3746_v42 }
 0x303   : > { %v3758_v61 = vpop.eup %3757  ;;  %3775 = vtanh.f32 %v1778_v57  ;;  %v1883_v62 = vadd.f32 %v1882_v55, %v4651_v48  ;;  %v1884_v2 = vpop.f32.mrb[69].mxu1  ;;  %v3410_v4 = vpack.c.bf16 %v3756_v59, %v3748_v45  ;;  %v4688_v55 = vld [vmem:[%s4908_s7 + $0x8] sm:$0xff] }
 0x304   : > { %v3760_v5 = vpop.eup %3759  ;;  %3777 = vtanh.f32 %v1776_v52  ;;  %v1885_v7 = vadd.f32 %v1884_v2, %v4651_v48  ;;  %v1953_v8 = vpop.f32.mrb[70].mxu0  ;;  %3397 = vmatprep.subr.bf16.mxu0 %v3396_v60  ;;  %v3408_v6 = vpack.c.bf16 %v3758_v61, %v3750_v46 }
 0x305   : > { %v3762_v10 = vpop.eup %3761  ;;  %3779 = vtanh.f32 %v1883_v62  ;;  %v1954_v1 = vadd.f32 %v1953_v8, %v4616_v21  ;;  %v1955_v11 = vpop.f32.mrb[71].mxu0  ;;  %3399 = vmatpush1.bf16.msra.mxu0 %v3398_v58 }
 0x306   : > { %v3764_v9 = vpop.eup %3763  ;;  %3781 = vtanh.f32 %v1885_v7  ;;  %v1956_v12 = vadd.f32 %v1955_v11, %v4616_v21  ;;  %v2060_v13 = vpop.f32.mrb[70].mxu1  ;;  %3409 = vmatprep.subr.bf16.mxu1 %v3408_v6 }
 0x307   : > { %v3766_v14 = vpop.eup %3765  ;;  %3783 = vtanh.f32 %v1954_v1  ;;  %v2061_v16 = vadd.f32 %v2060_v13, %v4616_v21  ;;  %v2062_v17 = vpop.f32.mrb[71].mxu1  ;;  %3411 = vmatpush1.bf16.msra.mxu1 %v3410_v4 }
 0x308   : > { %v3768_v18 = vpop.eup %3767  ;;  %3785 = vtanh.f32 %v1956_v12  ;;  %v2063_v20 = vadd.f32 %v2062_v17, %v4616_v21  ;;  %v1959_v25 = vpop.f32.mrb[72].mxu0 }
 0x309   : > { %v3770_v19 = vpop.eup %3769  ;;  %3787 = vtanh.f32 %v2061_v16  ;;  %v1960_v22 = vadd.f32 %v1959_v25, %v4621_v49  ;;  %v1961_v23 = vpop.f32.mrb[73].mxu0  ;;  %v3402_v26 = vpack.c.bf16 %v3768_v18, %v3760_v5  ;;  %v4706_v16 = vld [vmem:[%s4908_s7 + $0x10] sm:$0xff] }
 0x30a   : > { %v3772_v27 = vpop.eup %3771  ;;  %3789 = vtanh.f32 %v2063_v20  ;;  %v1962_v28 = vadd.f32 %v1961_v23, %v4621_v49  ;;  %v2066_v29 = vpop.f32.mrb[72].mxu1  ;;  %v3400_v30 = vpack.c.bf16 %v3770_v19, %v3762_v10 }
 0x30b   : > { %v3774_v24 = vpop.eup %3773  ;;  %3791 = vtanh.f32 %v1960_v22  ;;  %v2067_v31 = vadd.f32 %v2066_v29, %v4621_v49  ;;  %v2068_v33 = vpop.f32.mrb[73].mxu1  ;;  %v3414_v34 = vpack.c.bf16 %v3772_v27, %v3764_v9 }
 0x30c   : > { %3793 = vtanh.f32 %v1962_v28  ;;  %v2069_v21 = vadd.f32 %v2068_v33, %v4621_v49  ;;  %v1965_v36 = vpop.f32.mrb[74].mxu0  ;;  %3401 = vmatprep.subr.bf16.mxu0 %v3400_v30  ;;  %v3412_v37 = vpack.c.bf16 %v3774_v24, %v3766_v14 }
 0x30d   : > { %v3776_v38 = vpop.eup %3775  ;;  %3795 = vtanh.f32 %v2067_v31  ;;  %v1966_v39 = vadd.f32 %v1965_v36, %v4628_v0  ;;  %v1967_v40 = vpop.f32.mrb[75].mxu0  ;;  %3403 = vmatpush1.bf16.msra.mxu0 %v3402_v26  ;;  %v4719_v31 = vld [vmem:[%s4908_s7 + $0x18] sm:$0xff] }
 0x30e   : > { %v3778_v41 = vpop.eup %3777  ;;  %3797 = vtanh.f32 %v2069_v21  ;;  %v1968_v42 = vadd.f32 %v1967_v40, %v4628_v0  ;;  %v2072_v32 = vpop.f32.mrb[74].mxu1  ;;  %3246 = vmatprep.subr.msk.mxu0 %vm499_vm0, %v3776_v38  ;;  %3413 = vmatprep.subr.bf16.mxu1 %v3412_v37 }
 0x30f   : > { %v3780_v44 = vpop.eup %3779  ;;  %3799 = vtanh.f32 %v1966_v39  ;;  %v2073_v49 = vadd.f32 %v2072_v32, %v4628_v0  ;;  %v2074_v45 = vpop.f32.mrb[75].mxu1  ;;  %3415 = vmatpush1.bf16.msra.mxu1 %v3414_v34 }
 0x310   : > { %v3782_v43 = vpop.eup %3781  ;;  %3801 = vtanh.f32 %v1968_v42  ;;  %v2075_v46 = vadd.f32 %v2074_v45, %v4628_v0  ;;  %v1971_v47 = vpop.f32.mrb[76].mxu0 }
 0x311   : > { %v3784_v50 = vpop.eup %3783  ;;  %3803 = vtanh.f32 %v2073_v49  ;;  %v1972_v51 = vadd.f32 %v1971_v47, %v4633_v63  ;;  %v1973_v52 = vpop.f32.mrb[77].mxu0  ;;  %3255 = vmatprep.subr.msk.mxu1 %vm499_vm0, %v3782_v43  ;;  %3247 = vmatpush1.msk.msra.mxu0 %vm499_vm0, %v3778_v41 }
 0x312   : > { %v3786_v53 = vpop.eup %3785  ;;  %3805 = vtanh.f32 %v2075_v46  ;;  %v1974_v54 = vadd.f32 %v1973_v52, %v4633_v63  ;;  %v2078_v57 = vpop.f32.mrb[76].mxu1  ;;  %3248 = vmatmul.mubr.msk.f32.vlgmr.msra.gmra.mrb[84].mxu0 %vm1049_vm2, %v4673_v56  ;;  %v2162_v52 = vld [vmem:[%s4908_s7 + $0x28] sm:$0xff] }
 0x313   : > { %v3788_v58 = vpop.eup %3787  ;;  %3807 = vtanh.f32 %v1972_v51  ;;  %v2079_v0 = vadd.f32 %v2078_v57, %v4633_v63  ;;  %v2080_v59 = vpop.f32.mrb[77].mxu1  ;;  %3256 = vmatpush1.msk.msra.mxu1 %vm499_vm0, %v3780_v44  ;;  %2321 = vmatprep.mubr.f32.mxu0 %v3960_v3  ;;  %v4733_v44 = vld [vmem:[%s4908_s7 + $0x20] sm:$0xff] }
 0x314   : > { %v3790_v60 = vpop.eup %3789  ;;  %3809 = vtanh.f32 %v1974_v54  ;;  %v2081_v61 = vadd.f32 %v2080_v59, %v4633_v63  ;;  %v1977_v62 = vpop.f32.mrb[78].mxu0  ;;  %3257 = vmatmul.mubr.msk.f32.vlgmr.msra.gmra.mrb[84].mxu1 %vm1049_vm2, %v4673_v56  ;;  %v2163_v59 = vld [vmem:[%s4908_s7 + $0x30] sm:$0x3] }
 0x315   : > { %v3792_v2 = vpop.eup %3791  ;;  %3811 = vtanh.f32 %v2079_v0  ;;  %v1978_v4 = vadd.f32 %v1977_v62, %v4639_v15  ;;  %v1979_v5 = vpop.f32.mrb[79].mxu0  ;;  %2428 = vmatprep.mubr.f32.mxu1 %v3960_v3 }
 0x316   : > { %v3794_v7 = vpop.eup %3793  ;;  %3813 = vtanh.f32 %v2081_v61  ;;  %v1980_v8 = vadd.f32 %v1979_v5, %v4639_v15  ;;  %v2084_v6 = vpop.f32.mrb[78].mxu1  ;;  %3249 = vmatmul.mubr.msk.f32.gmra.mrb[86].mxu0 %vm1049_vm2, %v4688_v55  ;;  %v3418_v63 = vpack.c.bf16 %v3792_v2, %v3784_v50 }
 0x317   : > { %v3796_v10 = vpop.eup %3795  ;;  %3815 = vtanh.f32 %v1978_v4  ;;  %v2085_v1 = vadd.f32 %v2084_v6, %v4639_v15  ;;  %v2086_v11 = vpop.f32.mrb[79].mxu1  ;;  %v3416_v9 = vpack.c.bf16 %v3794_v7, %v3786_v53  ;;  %2327 = vmatprep.mubr.f32.mxu0 %v3960_v3 }
 0x318   : > { %v3798_v12 = vpop.eup %3797  ;;  %3817 = vtanh.f32 %v1980_v8  ;;  %v2087_v13 = vadd.f32 %v2086_v11, %v4639_v15  ;;  %v1983_v14 = vpop.f32.mrb[80].mxu0  ;;  %3258 = vmatmul.mubr.msk.f32.gmra.mrb[86].mxu1 %vm1049_vm2, %v4688_v55  ;;  %v3430_v17 = vpack.c.bf16 %v3796_v10, %v3788_v58 }
 0x319   : > { %v3800_v18 = vpop.eup %3799  ;;  %3819 = vtanh.f32 %v2085_v1  ;;  %v1984_v20 = vadd.f32 %v1983_v14, %v4645_v35  ;;  %v1985_v25 = vpop.f32.mrb[81].mxu0  ;;  %3417 = vmatprep.subr.bf16.mxu0 %v3416_v9  ;;  %v3428_v19 = vpack.c.bf16 %v3798_v12, %v3790_v60  ;;  %2434 = vmatprep.mubr.f32.mxu1 %v3960_v3 }
 0x31a   : > { %v3802_v15 = vpop.eup %3801  ;;  %3821 = vtanh.f32 %v2087_v13  ;;  %v1986_v22 = vadd.f32 %v1985_v25, %v4645_v35  ;;  %v2090_v23 = vpop.f32.mrb[80].mxu1  ;;  %3419 = vmatpush1.bf16.msra.mxu0 %v3418_v63 }
 0x31b   : > { %v3804_v26 = vpop.eup %3803  ;;  %3823 = vtanh.f32 %v1984_v20  ;;  %v2091_v27 = vadd.f32 %v2090_v23, %v4645_v35  ;;  %v2092_v28 = vpop.f32.mrb[81].mxu1  ;;  %3250 = vmatmul.mubr.msk.f32.gmra.mrb[88].mxu0 %vm1049_vm2, %v4706_v16  ;;  %3429 = vmatprep.subr.bf16.mxu1 %v3428_v19 }
 0x31c   : > { %v3806_v29 = vpop.eup %3805  ;;  %3825 = vtanh.f32 %v1986_v22  ;;  %v2093_v30 = vadd.f32 %v2092_v28, %v4645_v35  ;;  %v1989_v24 = vpop.f32.mrb[82].mxu0  ;;  %3431 = vmatpush1.bf16.msra.mxu1 %v3430_v17  ;;  %2333 = vmatprep.mubr.f32.mxu0 %v3960_v3 }
 0x31d   : > { %v3808_v33 = vpop.eup %3807  ;;  %3827 = vtanh.f32 %v2091_v27  ;;  %v1991_v34 = vpop.f32.mrb[83].mxu0  ;;  %3259 = vmatmul.mubr.msk.f32.gmra.mrb[88].mxu1 %vm1049_vm2, %v4706_v16  ;;  %v1990_v42 = vadd.f32 %v1989_v24, %v4651_v48 }
 0x31e   : > { %v3810_v21 = vpop.eup %3809  ;;  %3829 = vtanh.f32 %v2093_v30  ;;  %v1992_v36 = vadd.f32 %v1991_v34, %v4651_v48  ;;  %v2096_v35 = vpop.f32.mrb[82].mxu1  ;;  %2440 = vmatprep.mubr.f32.mxu1 %v3960_v3  ;;  %v3422_v37 = vpack.c.bf16 %v3808_v33, %v3800_v18 }
 0x31f   : > { %v3812_v38 = vpop.eup %3811  ;;  %v2098_v39 = vpop.f32.mrb[83].mxu1  ;;  %3251 = vmatmul.mubr.msk.f32.gmra.mrb[90].mxu0 %vm1049_vm2, %v4719_v31  ;;  %v3420_v40 = vpack.c.bf16 %v3810_v21, %v3802_v15  ;;  %v2097_v47 = vadd.f32 %v2096_v35, %v4651_v48 }
 0x320   : > { %v3814_v41 = vpop.eup %3813  ;;  %3831 = vtanh.f32 %v1992_v36  ;;  %v2099_v32 = vadd.f32 %v2098_v39, %v4651_v48  ;;  %2339 = vmatprep.mubr.f32.mxu0 %v3960_v3  ;;  %v3434_v49 = vpack.c.bf16 %v3812_v38, %v3804_v26  ;;  %v4806_v11 = vpop.permute.xlu0 %2178 }
 0x321   : > { %v3816_v45 = vpop.eup %3815  ;;  %3260 = vmatmul.mubr.msk.f32.gmra.mrb[90].mxu1 %vm1049_vm2, %v4719_v31  ;;  %3421 = vmatprep.subr.bf16.mxu0 %v3420_v40  ;;  %v3432_v43 = vpack.c.bf16 %v3814_v41, %v3806_v29 }
 0x322   : > { %v3818_v46 = vpop.eup %3817  ;;  %3833 = vtanh.f32 %v2099_v32  ;;  %3423 = vmatpush1.bf16.msra.mxu0 %v3422_v37  ;;  %2446 = vmatprep.mubr.f32.mxu1 %v3960_v3 }
 0x323   : > { %v3820_v50 = vpop.eup %3819  ;;  %3252 = vmatmul.mubr.msk.f32.gmra.mrb[92].mxu0 %vm1049_vm2, %v4733_v44  ;;  %3433 = vmatprep.subr.bf16.mxu1 %v3432_v43  ;;  %3835 = vtanh.f32 %v1990_v42 }
 0x324   : > { %v3822_v51 = vpop.eup %3821  ;;  %3435 = vmatpush1.bf16.msra.mxu1 %v3434_v49  ;;  %2345 = vmatprep.mubr.f32.mxu0 %v3960_v3  ;;  %3837 = vtanh.f32 %v2097_v47  ;;  %v4818_v24 = vpop.permute.xlu0 %2188 }
 0x325   : > { %v3824_v53 = vpop.eup %3823  ;;  %3261 = vmatmul.mubr.msk.f32.gmra.mrb[92].mxu1 %vm1049_vm2, %v4733_v44 }
 0x326   : > { %v3826_v48 = vpop.eup %3825  ;;  %2452 = vmatprep.mubr.f32.mxu1 %v3960_v3  ;;  %v3426_v54 = vpack.c.bf16 %v3824_v53, %v3816_v45 }
 0x327   : > { %v3828_v57 = vpop.eup %3827  ;;  %3253 = vmatmul.mubr.msk.f32.gmra.mrb[94].mxu0 %vm1049_vm2, %v2162_v52  ;;  %v3424_v58 = vpack.c.bf16 %v3826_v48, %v3818_v46 }
 0x328   : > { %v3830_v0 = vpop.eup %3829  ;;  %2351 = vmatprep.mubr.f32.mxu0 %v3960_v3  ;;  %v3438_v60 = vpack.c.bf16 %v3828_v57, %v3820_v50 }
 0x329   : > { %3262 = vmatmul.mubr.msk.f32.gmra.mrb[94].mxu1 %vm1049_vm2, %v2162_v52  ;;  %3425 = vmatprep.subr.bf16.mxu0 %v3424_v58  ;;  %v3436_v61 = vpack.c.bf16 %v3830_v0, %v3822_v51  ;;  %v4830_v0 = vpop.permute.xlu0 %2198 }
 0x32a   : > { %v3832_v62 = vpop.eup %3831  ;;  %3427 = vmatpush1.bf16.msra.mxu0 %v3426_v54  ;;  %2458 = vmatprep.mubr.f32.mxu1 %v3960_v3 }
 0x32b   : > { %3254 = vmatmul.mubr.msk.f32.gmra.mrb[96].mxu0 %vm1049_vm2, %v2163_v59  ;;  %3264 = vmatprep.subr.msk.mxu0 %vm499_vm0, %v3832_v62 }
 0x32c   : > { %v3834_v2 = vpop.eup %3833  ;;  %3437 = vmatprep.subr.bf16.mxu1 %v3436_v61  ;;  %2529 = vmatprep.mubr.f32.mxu0 %v3960_v3 }
 0x32d   : > { %3439 = vmatpush1.bf16.msra.mxu1 %v3438_v60  ;;  %v3836_v4 = vpop.eup %3835 }
 0x32e   : > { %3263 = vmatmul.mubr.msk.f32.gmra.mrb[96].mxu1 %vm1049_vm2, %v2163_v59  ;;  %3273 = vmatprep.subr.msk.mxu1 %vm499_vm0, %v3834_v2  ;;  %v3838_v5 = vpop.eup %3837 }
 0x32f   : > { %3265 = vmatpush1.msk.msra.mxu0 %vm499_vm0, %v3836_v4  ;;  %2636 = vmatprep.mubr.f32.mxu1 %v3960_v3 }
 0x330   : > { %3266 = vmatmul.mubr.msk.f32.vlgmr.msra.gmra.mrb[98].mxu0 %vm1049_vm2, %v4673_v56 }
 0x331   : > { %3274 = vmatpush1.msk.msra.mxu1 %vm499_vm0, %v3838_v5  ;;  %2535 = vmatprep.mubr.f32.mxu0 %v3960_v3 }
 0x332   : > { %3275 = vmatmul.mubr.msk.f32.vlgmr.msra.gmra.mrb[98].mxu1 %vm1049_vm2, %v4673_v56  ;;  %v4801_v56 = vpop.permute.xlu1 %2173 }
 0x333   : > { %2642 = vmatprep.mubr.f32.mxu1 %v3960_v3 }
 0x334   : > { %3267 = vmatmul.mubr.msk.f32.gmra.mrb[100].mxu0 %vm1049_vm2, %v4688_v55 }
 0x335   : > { %2541 = vmatprep.mubr.f32.mxu0 %v3960_v3 }
 0x336   : > { %3276 = vmatmul.mubr.msk.f32.gmra.mrb[100].mxu1 %vm1049_vm2, %v4688_v55  ;;  %v4813_v19 = vpop.permute.xlu1 %2183 }
 0x337   : > { %2648 = vmatprep.mubr.f32.mxu1 %v3960_v3 }
 0x338   : > { %3268 = vmatmul.mubr.msk.f32.gmra.mrb[102].mxu0 %vm1049_vm2, %v4706_v16 }
 0x339   : > { %2547 = vmatprep.mubr.f32.mxu0 %v3960_v3 }
 0x33a   : > { %3277 = vmatmul.mubr.msk.f32.gmra.mrb[102].mxu1 %vm1049_vm2, %v4706_v16  ;;  %v4824_v32 = vpop.permute.xlu1 %2193 }
 0x33b   : > { %2654 = vmatprep.mubr.f32.mxu1 %v3960_v3 }
 0x33c   : > { %3269 = vmatmul.mubr.msk.f32.gmra.mrb[104].mxu0 %vm1049_vm2, %v4719_v31 }
 0x33d   : > { %2553 = vmatprep.mubr.f32.mxu0 %v3960_v3 }
 0x33e   : > { %3278 = vmatmul.mubr.msk.f32.gmra.mrb[104].mxu1 %vm1049_vm2, %v4719_v31 }
 0x33f   : > { %2660 = vmatprep.mubr.f32.mxu1 %v3960_v3 }
 0x340   : > { %3270 = vmatmul.mubr.msk.f32.gmra.mrb[106].mxu0 %vm1049_vm2, %v4733_v44 }
 0x341   : > { %2559 = vmatprep.mubr.f32.mxu0 %v3960_v3 }
 0x342   : > { %3279 = vmatmul.mubr.msk.f32.gmra.mrb[106].mxu1 %vm1049_vm2, %v4733_v44 }
 0x343   : > { %2666 = vmatprep.mubr.f32.mxu1 %v3960_v3 }
 0x344   : > { %3271 = vmatmul.mubr.msk.f32.gmra.mrb[108].mxu0 %vm1049_vm2, %v2162_v52 }
 0x345   : > { %2565 = vmatprep.mubr.f32.mxu0 %v3960_v3 }
 0x346   : > { %3280 = vmatmul.mubr.msk.f32.gmra.mrb[108].mxu1 %vm1049_vm2, %v2162_v52 }
 0x347   : > { %2672 = vmatprep.mubr.f32.mxu1 %v3960_v3 }
 0x348   : > { %3272 = vmatmul.mubr.msk.f32.gmra.mrb[110].mxu0 %vm1049_vm2, %v2163_v59 }
 0x349   : > { %2833 = vmatprep.mubr.f32.mxu0 %v3960_v3 }
 0x34a   : > { %3281 = vmatmul.mubr.msk.f32.gmra.mrb[110].mxu1 %vm1049_vm2, %v2163_v59 }
 0x34b   : > { %2904 = vmatprep.mubr.f32.mxu1 %v3960_v3 }
 0x3e5   : > { %v2317_v55 = vpop.f32.mrb[84].mxu0 }
 0x3e6   : > { %v2318_v7 = vadd.f32 %v2317_v55, %v4801_v56  ;;  %v2319_v8 = vpop.f32.mrb[85].mxu0 }
 0x3e7   : > { %v2320_v6 = vadd.f32 %v2319_v8, %v4801_v56  ;;  %v2424_v63 = vpop.f32.mrb[84].mxu1 }
 0x3e8   : > { %3839 = vtanh.f32 %v2318_v7  ;;  %v2425_v10 = vadd.f32 %v2424_v63, %v4801_v56  ;;  %v2426_v1 = vpop.f32.mrb[85].mxu1 }
 0x3e9   : > { %3841 = vtanh.f32 %v2320_v6  ;;  %v2427_v9 = vadd.f32 %v2426_v1, %v4801_v56  ;;  %v2323_v12 = vpop.f32.mrb[86].mxu0  ;;  %v4836_v1 = vpop.permute.xlu1 %2203 }
 0x3ea   : > { %3843 = vtanh.f32 %v2425_v10  ;;  %v2324_v13 = vadd.f32 %v2323_v12, %v4806_v11  ;;  %v2325_v14 = vpop.f32.mrb[87].mxu0 }
 0x3eb   : > { %3845 = vtanh.f32 %v2427_v9  ;;  %v2326_v16 = vadd.f32 %v2325_v14, %v4806_v11  ;;  %v2430_v17 = vpop.f32.mrb[86].mxu1 }
 0x3ec   : > { %3847 = vtanh.f32 %v2324_v13  ;;  %v2431_v18 = vadd.f32 %v2430_v17, %v4806_v11  ;;  %v2432_v20 = vpop.f32.mrb[87].mxu1 }
 0x3ed   : > { %3849 = vtanh.f32 %v2326_v16  ;;  %v2433_v25 = vadd.f32 %v2432_v20, %v4806_v11 }
 0x3ee   : > { %3851 = vtanh.f32 %v2431_v18  ;;  %v2329_v15 = vpop.f32.mrb[88].mxu0 }
 0x3ef   : > { %3853 = vtanh.f32 %v2433_v25  ;;  %v2330_v22 = vadd.f32 %v2329_v15, %v4813_v19  ;;  %v2331_v23 = vpop.f32.mrb[89].mxu0 }
 0x3f0   : > { %v2332_v26 = vadd.f32 %v2331_v23, %v4813_v19  ;;  %v2436_v27 = vpop.f32.mrb[88].mxu1 }
 0x3f1   : > { %3855 = vtanh.f32 %v2330_v22  ;;  %v2437_v28 = vadd.f32 %v2436_v27, %v4813_v19  ;;  %v2438_v29 = vpop.f32.mrb[89].mxu1 }
 0x3f2   : > { %v3840_v30 = vpop.eup %3839  ;;  %3857 = vtanh.f32 %v2332_v26  ;;  %v2439_v31 = vadd.f32 %v2438_v29, %v4813_v19  ;;  %v2335_v33 = vpop.f32.mrb[90].mxu0 }
 0x3f3   : > { %v3842_v34 = vpop.eup %3841  ;;  %3859 = vtanh.f32 %v2437_v28  ;;  %v2336_v21 = vadd.f32 %v2335_v33, %v4818_v24  ;;  %v2337_v36 = vpop.f32.mrb[91].mxu0 }
 0x3f4   : > { %v3844_v35 = vpop.eup %3843  ;;  %3861 = vtanh.f32 %v2439_v31  ;;  %v2338_v37 = vadd.f32 %v2337_v36, %v4818_v24  ;;  %v2442_v38 = vpop.f32.mrb[90].mxu1 }
 0x3f5   : > { %v3846_v39 = vpop.eup %3845  ;;  %3863 = vtanh.f32 %v2336_v21  ;;  %v2443_v40 = vadd.f32 %v2442_v38, %v4818_v24  ;;  %v2444_v41 = vpop.f32.mrb[91].mxu1 }
 0x3f6   : > { %v3848_v42 = vpop.eup %3847  ;;  %3865 = vtanh.f32 %v2338_v37  ;;  %v2445_v44 = vadd.f32 %v2444_v41, %v4818_v24  ;;  %v2341_v49 = vpop.f32.mrb[92].mxu0 }
 0x3f7   : > { %v3850_v45 = vpop.eup %3849  ;;  %3867 = vtanh.f32 %v2443_v40  ;;  %v2342_v43 = vadd.f32 %v2341_v49, %v4824_v32  ;;  %v2343_v46 = vpop.f32.mrb[93].mxu0  ;;  %v3442_v47 = vpack.c.bf16 %v3848_v42, %v3840_v30 }
 0x3f8   : > { %v3852_v50 = vpop.eup %3851  ;;  %3869 = vtanh.f32 %v2445_v44  ;;  %v2344_v51 = vadd.f32 %v2343_v46, %v4824_v32  ;;  %v2448_v52 = vpop.f32.mrb[92].mxu1  ;;  %v3440_v53 = vpack.c.bf16 %v3850_v45, %v3842_v34 }
 0x3f9   : > { %v3854_v48 = vpop.eup %3853  ;;  %3871 = vtanh.f32 %v2342_v43  ;;  %v2449_v54 = vadd.f32 %v2448_v52, %v4824_v32  ;;  %v2450_v57 = vpop.f32.mrb[93].mxu1  ;;  %v3454_v58 = vpack.c.bf16 %v3852_v50, %v3844_v35 }
 0x3fa   : > { %3873 = vtanh.f32 %v2344_v51  ;;  %v2451_v59 = vadd.f32 %v2450_v57, %v4824_v32  ;;  %v2347_v60 = vpop.f32.mrb[94].mxu0  ;;  %3441 = vmatprep.subr.bf16.mxu0 %v3440_v53  ;;  %v3452_v61 = vpack.c.bf16 %v3854_v48, %v3846_v39 }
 0x3fb   : > { %v3856_v62 = vpop.eup %3855  ;;  %3875 = vtanh.f32 %v2449_v54  ;;  %v2348_v2 = vadd.f32 %v2347_v60, %v4830_v0  ;;  %v2349_v4 = vpop.f32.mrb[95].mxu0  ;;  %3443 = vmatpush1.bf16.msra.mxu0 %v3442_v47 }
 0x3fc   : > { %v3858_v5 = vpop.eup %3857  ;;  %3877 = vtanh.f32 %v2451_v59  ;;  %v2350_v55 = vadd.f32 %v2349_v4, %v4830_v0  ;;  %v2454_v7 = vpop.f32.mrb[94].mxu1  ;;  %3453 = vmatprep.subr.bf16.mxu1 %v3452_v61 }
 0x3fd   : > { %v3860_v8 = vpop.eup %3859  ;;  %3879 = vtanh.f32 %v2348_v2  ;;  %v2455_v6 = vadd.f32 %v2454_v7, %v4830_v0  ;;  %v2456_v63 = vpop.f32.mrb[95].mxu1  ;;  %3455 = vmatpush1.bf16.msra.mxu1 %v3454_v58 }
 0x3fe   : > { %v3862_v10 = vpop.eup %3861  ;;  %3881 = vtanh.f32 %v2350_v55  ;;  %v2457_v9 = vadd.f32 %v2456_v63, %v4830_v0  ;;  %v2353_v12 = vpop.f32.mrb[96].mxu0 }
 0x3ff   : > { %v3864_v13 = vpop.eup %3863  ;;  %3883 = vtanh.f32 %v2455_v6  ;;  %v2354_v14 = vadd.f32 %v2353_v12, %v4836_v1  ;;  %v2355_v16 = vpop.f32.mrb[97].mxu0  ;;  %v4858_v6 = vld [vmem:[%s4910_s9] sm:$0xf] }
 0x400   : > { %v3866_v17 = vpop.eup %3865  ;;  %3885 = vtanh.f32 %v2457_v9  ;;  %v2356_v18 = vadd.f32 %v2355_v16, %v4836_v1  ;;  %v3446_v20 = vpack.c.bf16 %v3864_v13, %v3856_v62 }
 0x401   : > { %v3868_v25 = vpop.eup %3867  ;;  %v2460_v15 = vpop.f32.mrb[96].mxu1  ;;  %v3444_v22 = vpack.c.bf16 %v3866_v17, %v3858_v5 }
 0x402   : > { %v3870_v23 = vpop.eup %3869  ;;  %3887 = vtanh.f32 %v2356_v18  ;;  %v2461_v26 = vadd.f32 %v2460_v15, %v4836_v1  ;;  %v2462_v27 = vpop.f32.mrb[97].mxu1  ;;  %v3458_v28 = vpack.c.bf16 %v3868_v25, %v3860_v8 }
 0x403   : > { %v3872_v29 = vpop.eup %3871  ;;  %3889 = vtanh.f32 %v2354_v14  ;;  %v2463_v30 = vadd.f32 %v2462_v27, %v4836_v1  ;;  %v2531_v31 = vpop.f32.mrb[98].mxu0  ;;  %3445 = vmatprep.subr.bf16.mxu0 %v3444_v22  ;;  %v3456_v33 = vpack.c.bf16 %v3870_v23, %v3862_v10 }
 0x404   : > { %v3874_v34 = vpop.eup %3873  ;;  %3891 = vtanh.f32 %v2461_v26  ;;  %v2532_v21 = vadd.f32 %v2531_v31, %v4801_v56  ;;  %v2533_v36 = vpop.f32.mrb[99].mxu0  ;;  %3447 = vmatpush1.bf16.msra.mxu0 %v3446_v20 }
 0x405   : > { %v3876_v35 = vpop.eup %3875  ;;  %3893 = vtanh.f32 %v2463_v30  ;;  %v2534_v37 = vadd.f32 %v2533_v36, %v4801_v56  ;;  %v2638_v38 = vpop.f32.mrb[98].mxu1  ;;  %3457 = vmatprep.subr.bf16.mxu1 %v3456_v33 }
 0x406   : > { %v3878_v39 = vpop.eup %3877  ;;  %3895 = vtanh.f32 %v2532_v21  ;;  %v2639_v40 = vadd.f32 %v2638_v38, %v4801_v56  ;;  %v2640_v41 = vpop.f32.mrb[99].mxu1  ;;  %3459 = vmatpush1.bf16.msra.mxu1 %v3458_v28 }
 0x407   : > { %v3880_v42 = vpop.eup %3879  ;;  %3897 = vtanh.f32 %v2534_v37  ;;  %v2641_v44 = vadd.f32 %v2640_v41, %v4801_v56  ;;  %v2537_v49 = vpop.f32.mrb[100].mxu0 }
 0x408   : > { %v3882_v45 = vpop.eup %3881  ;;  %3899 = vtanh.f32 %v2639_v40  ;;  %v2538_v43 = vadd.f32 %v2537_v49, %v4806_v11  ;;  %v2539_v46 = vpop.f32.mrb[101].mxu0  ;;  %v3450_v47 = vpack.c.bf16 %v3880_v42, %v3872_v29 }
 0x409   : > { %v3884_v50 = vpop.eup %3883  ;;  %3901 = vtanh.f32 %v2641_v44  ;;  %v2540_v51 = vadd.f32 %v2539_v46, %v4806_v11  ;;  %v2644_v52 = vpop.f32.mrb[100].mxu1  ;;  %v3448_v53 = vpack.c.bf16 %v3882_v45, %v3874_v34 }
 0x40a   : > { %v3886_v48 = vpop.eup %3885  ;;  %3903 = vtanh.f32 %v2538_v43  ;;  %v2645_v54 = vadd.f32 %v2644_v52, %v4806_v11  ;;  %v2646_v57 = vpop.f32.mrb[101].mxu1  ;;  %v3462_v58 = vpack.c.bf16 %v3884_v50, %v3876_v35 }
 0x40b   : > { %3905 = vtanh.f32 %v2540_v51  ;;  %v2647_v56 = vadd.f32 %v2646_v57, %v4806_v11  ;;  %v2543_v59 = vpop.f32.mrb[102].mxu0  ;;  %3449 = vmatprep.subr.bf16.mxu0 %v3448_v53  ;;  %v3460_v60 = vpack.c.bf16 %v3886_v48, %v3878_v39 }
 0x40c   : > { %v3888_v61 = vpop.eup %3887  ;;  %3907 = vtanh.f32 %v2645_v54  ;;  %v2544_v62 = vadd.f32 %v2543_v59, %v4813_v19  ;;  %v2545_v2 = vpop.f32.mrb[103].mxu0  ;;  %3451 = vmatpush1.bf16.msra.mxu0 %v3450_v47 }
 0x40d   : > { %v3890_v4 = vpop.eup %3889  ;;  %3909 = vtanh.f32 %v2647_v56  ;;  %v2546_v5 = vadd.f32 %v2545_v2, %v4813_v19  ;;  %v2650_v55 = vpop.f32.mrb[102].mxu1  ;;  %3282 = vmatprep.subr.msk.mxu0 %vm499_vm0, %v3888_v61  ;;  %3461 = vmatprep.subr.bf16.mxu1 %v3460_v60 }
 0x40e   : > { %v3892_v7 = vpop.eup %3891  ;;  %3911 = vtanh.f32 %v2544_v62  ;;  %v2651_v11 = vadd.f32 %v2650_v55, %v4813_v19  ;;  %v2652_v8 = vpop.f32.mrb[103].mxu1  ;;  %3463 = vmatpush1.bf16.msra.mxu1 %v3462_v58 }
 0x40f   : > { %v3894_v63 = vpop.eup %3893  ;;  %3913 = vtanh.f32 %v2546_v5  ;;  %v2653_v10 = vadd.f32 %v2652_v8, %v4813_v19  ;;  %v2549_v9 = vpop.f32.mrb[104].mxu0 }
 0x410   : > { %v3896_v12 = vpop.eup %3895  ;;  %3915 = vtanh.f32 %v2651_v11  ;;  %v2550_v13 = vadd.f32 %v2549_v9, %v4818_v24  ;;  %v2551_v14 = vpop.f32.mrb[105].mxu0  ;;  %3285 = vmatprep.subr.msk.mxu1 %vm499_vm0, %v3894_v63  ;;  %3283 = vmatpush1.msk.msra.mxu0 %vm499_vm0, %v3890_v4 }
 0x411   : > { %v3898_v16 = vpop.eup %3897  ;;  %3917 = vtanh.f32 %v2653_v10  ;;  %v2552_v17 = vadd.f32 %v2551_v14, %v4818_v24  ;;  %v2656_v18 = vpop.f32.mrb[104].mxu1  ;;  %3284 = vmatmul.mubr.msk.f32.vlgmr.msra.gmra.mrb[112].mxu0 %vm1049_vm2, %v4858_v6 }
 0x412   : > { %v3900_v20 = vpop.eup %3899  ;;  %3919 = vtanh.f32 %v2550_v13  ;;  %v2657_v19 = vadd.f32 %v2656_v18, %v4818_v24  ;;  %v2658_v25 = vpop.f32.mrb[105].mxu1  ;;  %3286 = vmatpush1.msk.msra.mxu1 %vm499_vm0, %v3892_v7  ;;  %2975 = vmatprep.mubr.f32.mxu0 %v3960_v3 }
 0x413   : > { %v3902_v15 = vpop.eup %3901  ;;  %3921 = vtanh.f32 %v2552_v17  ;;  %v2659_v22 = vadd.f32 %v2658_v25, %v4818_v24  ;;  %v2555_v23 = vpop.f32.mrb[106].mxu0  ;;  %3287 = vmatmul.mubr.msk.f32.vlgmr.msra.gmra.mrb[112].mxu1 %vm1049_vm2, %v4858_v6 }
 0x414   : > { %v3904_v26 = vpop.eup %3903  ;;  %3923 = vtanh.f32 %v2657_v19  ;;  %v2556_v27 = vadd.f32 %v2555_v23, %v4824_v32  ;;  %v2557_v28 = vpop.f32.mrb[107].mxu0  ;;  %3046 = vmatprep.mubr.f32.mxu1 %v3960_v3 }
 0x415   : > { %v3906_v29 = vpop.eup %3905  ;;  %3925 = vtanh.f32 %v2659_v22  ;;  %v2558_v30 = vadd.f32 %v2557_v28, %v4824_v32  ;;  %v2662_v31 = vpop.f32.mrb[106].mxu1  ;;  %v3466_v33 = vpack.c.bf16 %v3904_v26, %v3896_v12 }
 0x416   : > { %v3908_v34 = vpop.eup %3907  ;;  %3927 = vtanh.f32 %v2556_v27  ;;  %v2663_v24 = vadd.f32 %v2662_v31, %v4824_v32  ;;  %v2664_v21 = vpop.f32.mrb[107].mxu1  ;;  %v3464_v36 = vpack.c.bf16 %v3906_v29, %v3898_v16 }
 0x417   : > { %v3910_v35 = vpop.eup %3909  ;;  %3929 = vtanh.f32 %v2558_v30  ;;  %v2665_v37 = vadd.f32 %v2664_v21, %v4824_v32  ;;  %v2561_v38 = vpop.f32.mrb[108].mxu0  ;;  %v3478_v39 = vpack.c.bf16 %v3908_v34, %v3900_v20 }
 0x418   : > { %v3912_v40 = vpop.eup %3911  ;;  %3931 = vtanh.f32 %v2663_v24  ;;  %v2562_v3 = vadd.f32 %v2561_v38, %v4830_v0  ;;  %v2563_v41 = vpop.f32.mrb[109].mxu0  ;;  %3465 = vmatprep.subr.bf16.mxu0 %v3464_v36  ;;  %v3476_v42 = vpack.c.bf16 %v3910_v35, %v3902_v15 }
 0x419   : > { %v3914_v44 = vpop.eup %3913  ;;  %3933 = vtanh.f32 %v2665_v37  ;;  %v2564_v49 = vadd.f32 %v2563_v41, %v4830_v0  ;;  %v2668_v45 = vpop.f32.mrb[108].mxu1  ;;  %3467 = vmatpush1.bf16.msra.mxu0 %v3466_v33 }
 0x41a   : > { %v3916_v43 = vpop.eup %3915  ;;  %3935 = vtanh.f32 %v2562_v3  ;;  %v2669_v46 = vadd.f32 %v2668_v45, %v4830_v0  ;;  %v2670_v32 = vpop.f32.mrb[109].mxu1  ;;  %3477 = vmatprep.subr.bf16.mxu1 %v3476_v42 }
 0x41b   : > { %v3918_v47 = vpop.eup %3917  ;;  %3937 = vtanh.f32 %v2564_v49  ;;  %v2671_v50 = vadd.f32 %v2670_v32, %v4830_v0  ;;  %v2567_v51 = vpop.f32.mrb[110].mxu0  ;;  %3479 = vmatpush1.bf16.msra.mxu1 %v3478_v39 }
 0x41c   : > { %v3920_v52 = vpop.eup %3919  ;;  %3939 = vtanh.f32 %v2669_v46  ;;  %v2569_v53 = vpop.f32.mrb[111].mxu0  ;;  %v2568_v59 = vadd.f32 %v2567_v51, %v4836_v1 }
 0x41d   : > { %v3922_v48 = vpop.eup %3921  ;;  %3941 = vtanh.f32 %v2671_v50  ;;  %v2570_v54 = vadd.f32 %v2569_v53, %v4836_v1  ;;  %v2674_v57 = vpop.f32.mrb[110].mxu1  ;;  %v3470_v58 = vpack.c.bf16 %v3920_v52, %v3912_v40 }
 0x41e   : > { %v3924_v56 = vpop.eup %3923  ;;  %v2676_v60 = vpop.f32.mrb[111].mxu1  ;;  %v3468_v61 = vpack.c.bf16 %v3922_v48, %v3914_v44  ;;  %v2675_v5 = vadd.f32 %v2674_v57, %v4836_v1 }
 0x41f   : > { %v3926_v62 = vpop.eup %3925  ;;  %3943 = vtanh.f32 %v2570_v54  ;;  %v2677_v0 = vadd.f32 %v2676_v60, %v4836_v1  ;;  %v3482_v2 = vpack.c.bf16 %v3924_v56, %v3916_v43  ;;  %v2740_v25 = vpop.permute.xlu0 %2739 }
 0x420   : > { %v3928_v4 = vpop.eup %3927  ;;  %3469 = vmatprep.subr.bf16.mxu0 %v3468_v61  ;;  %v3480_v55 = vpack.c.bf16 %v3926_v62, %v3918_v47 }
 0x421   : > { %v3930_v7 = vpop.eup %3929  ;;  %3945 = vtanh.f32 %v2677_v0  ;;  %3471 = vmatpush1.bf16.msra.mxu0 %v3470_v58 }
 0x422   : > { %v3932_v11 = vpop.eup %3931  ;;  %3947 = vtanh.f32 %v2568_v59  ;;  %3481 = vmatprep.subr.bf16.mxu1 %v3480_v55 }
 0x423   : > { %v3934_v8 = vpop.eup %3933  ;;  %3483 = vmatpush1.bf16.msra.mxu1 %v3482_v2  ;;  %3949 = vtanh.f32 %v2675_v5 }
 0x424   : > { %v3936_v63 = vpop.eup %3935 }
 0x425   : > { %v3938_v10 = vpop.eup %3937  ;;  %v3474_v9 = vpack.c.bf16 %v3936_v63, %v3928_v4 }
 0x426   : > { %v3940_v12 = vpop.eup %3939  ;;  %v3472_v13 = vpack.c.bf16 %v3938_v10, %v3930_v7 }
 0x427   : > { %v3942_v14 = vpop.eup %3941  ;;  %v3486_v16 = vpack.c.bf16 %v3940_v12, %v3932_v11 }
 0x428   : > { %3473 = vmatprep.subr.bf16.mxu0 %v3472_v13  ;;  %v3484_v1 = vpack.c.bf16 %v3942_v14, %v3934_v8 }
 0x429   : > { %v3944_v17 = vpop.eup %3943  ;;  %3475 = vmatpush1.bf16.msra.mxu0 %v3474_v9 }
 0x42a   : > { %3288 = vmatprep.subr.msk.mxu0 %vm499_vm0, %v3944_v17  ;;  %3485 = vmatprep.subr.bf16.mxu1 %v3484_v1 }
 0x42b   : > { %v3946_v18 = vpop.eup %3945  ;;  %3487 = vmatpush1.bf16.msra.mxu1 %v3486_v16 }
 0x42c   : > { %v3948_v20 = vpop.eup %3947  ;;  %3291 = vmatprep.subr.msk.mxu1 %vm499_vm0, %v3946_v18 }
 0x42d   : > { %3289 = vmatpush1.msk.msra.mxu0 %vm499_vm0, %v3948_v20  ;;  %v3950_v19 = vpop.eup %3949 }
 0x42e   : > { %3290 = vmatmul.mubr.msk.f32.vlgmr.msra.gmra.mrb[114].mxu0 %vm1049_vm2, %v4858_v6 }
 0x42f   : > { %3292 = vmatpush1.msk.msra.mxu1 %vm499_vm0, %v3950_v19 }
 0x430   : > { %3293 = vmatmul.mubr.msk.f32.vlgmr.msra.gmra.mrb[114].mxu1 %vm1049_vm2, %v4858_v6 }
 0x4e4   : > { %v2835_v15 = vpop.f32.mrb[112].mxu0 }
 0x4e5   : > { %v2836_v22 = vadd.f32 %v2835_v15, %v2740_v25  ;;  %v2837_v23 = vpop.f32.mrb[113].mxu0 }
 0x4e6   : > { %v2838_v26 = vadd.f32 %v2837_v23, %v2740_v25  ;;  %v2906_v27 = vpop.f32.mrb[112].mxu1 }
 0x4e7   : > { %v2907_v28 = vadd.f32 %v2906_v27, %v2740_v25  ;;  %v2908_v29 = vpop.f32.mrb[113].mxu1 }
 0x4e8   : > { %v3061_v30 = vcombine.low %v2836_v22, %v2838_v26  ;;  %v2909_v31 = vadd.f32 %v2908_v29, %v2740_v25 }
 0x4ea   : > { %3069 = vst [vmem:[%s388_s24] sm:$0xff] %v3061_v30  ;;  %v3062_v33 = vcombine.low %v2907_v28, %v2909_v31 }
 0x4ec   : > { %3070 = vst [vmem:[%s388_s24 + $0x8] sm:$0xff] %v3062_v33 }
 0x501   : > { %v2977_v34 = vpop.f32.mrb[114].mxu0 }
 0x502   : > { %v2978_v6 = vadd.f32 %v2977_v34, %v2740_v25  ;;  %v2979_v24 = vpop.f32.mrb[115].mxu0 }
 0x503   : > { %v2980_v21 = vadd.f32 %v2979_v24, %v2740_v25  ;;  %v3048_v36 = vpop.f32.mrb[114].mxu1 }
 0x504   : > { %v3049_v35 = vadd.f32 %v3048_v36, %v2740_v25  ;;  %v3050_v37 = vpop.f32.mrb[115].mxu1 }
 0x505   : > { %v3063_v38 = vcombine.low %v2978_v6, %v2980_v21  ;;  %v3051_v39 = vadd.f32 %v3050_v37, %v2740_v25 }
 0x507   : > { %3071 = vst [vmem:[%s388_s24 + $0x10] sm:$0xff] %v3063_v38  ;;  %v3064_v40 = vcombine.low %v3049_v35, %v3051_v39 }
 0x509   : > { %3072 = vst [vmem:[%s388_s24 + $0x18] sm:$0xff] %v3064_v40 }
 0x50a PF: > { %s21_s17 = sadd.s32 1, %s3957_s17  }
 0x50b   : > { %p18_p4 = scmp.ge.s32.totalorder %s21_s17, 5  }
 0x50d   :  { %20 = sbr.rel (!%p18_p4) target bundleno = 1 (0x1), region = 94 }

</bundles_post_ra>
